<compile_context>
chip_gen: v6e
topology: v6e:2x2x1
jax: 0.10.0
libtpu: 0.0.40
codegen_flags: <defaults>
</compile_context>

<pallas_src>
import jax
import jax.numpy as jnp
from jax.experimental import pallas as pl
from jax.experimental.pallas import tpu as pltpu

# Fixed MLP widths from the module.
_H1, _H2, _H3 = 1024, 512, 128
_N_OUT = 2          # true output width
_N_PAD = 128        # lane-dense padded width for the final layer
_BIAS_TOT = _H1 + _H2 + _H3 + _N_PAD   # 1792, packed-bias width


# ---------------------------------------------------------------------------
# Pallas kernel: fused split-K layer-1 + 3x (matmul + bias + ReLU) + padded
# final layer. Single program (grid=()); everything fits in VMEM.
# Weights arrive as bf16; activations are cast to bf16 at each dot, and all
# MXU matmuls accumulate in f32.
# ---------------------------------------------------------------------------
def _mlp_mo_kernel(cnv_ref, meth_ref, rna_ref,
                   w1a_ref, w1b_ref, w1c_ref,
                   w2_ref, w3_ref, w4_ref,
                   bias_ref, out_ref):
    f32 = jnp.float32
    bf16 = jnp.bfloat16

    # Static, lane-aligned slices of the packed bias slab (1, 1792).
    b1 = bias_ref[:, 0:_H1]                                   # (1, 1024)
    b2 = bias_ref[:, _H1:_H1 + _H2]                           # (1, 512)
    b3 = bias_ref[:, _H1 + _H2:_H1 + _H2 + _H3]               # (1, 128)
    b4 = bias_ref[:, _H1 + _H2 + _H3:_BIAS_TOT]               # (1, 128) padded

    # Layer 1: split-K matmul replaces torch.cat([CNV, meth, RNA], dim=1).
    h = jnp.dot(cnv_ref[...].astype(bf16), w1a_ref[...], preferred_element_type=f32)
    h = h + jnp.dot(meth_ref[...].astype(bf16), w1b_ref[...], preferred_element_type=f32)
    h = h + jnp.dot(rna_ref[...].astype(bf16), w1c_ref[...], preferred_element_type=f32)
    h = jnp.maximum(h + b1, 0.0)                              # ReLU (Dropout = id)

    # Layer 2: Linear + ReLU  (bf16 x bf16 -> f32 accumulate)
    h = jnp.dot(h.astype(bf16), w2_ref[...], preferred_element_type=f32) + b2
    h = jnp.maximum(h, 0.0)

    # Layer 3: Linear + ReLU
    h = jnp.dot(h.astype(bf16), w3_ref[...], preferred_element_type=f32) + b3
    h = jnp.maximum(h, 0.0)

    # Layer 4: Linear into a lane-dense (B, 128) slab; columns >= 2 are zero
    # padding and are sliced off in the wrapper.
    out_ref[...] = (
        jnp.dot(h.astype(bf16), w4_ref[...], preferred_element_type=f32) + b4
    ).astype(out_ref.dtype)


# ---------------------------------------------------------------------------
# One-time parameter preparation (hoisted OUT of the per-call jitted path).
# ---------------------------------------------------------------------------
def prepare_params(params, f_cnv, f_meth):
    """bf16-cast, K-split W1, pad W4/b4 to lane width, pack biases. Run once."""
    w1, b1, w2, b2, w3, b3, w4, b4 = params
    bf16, f32 = jnp.bfloat16, jnp.float32

    # Split W1 along its input (K) axis to match the [CNV, meth, RNA] order.
    w1a = w1[:f_cnv, :].astype(bf16)
    w1b = w1[f_cnv:f_cnv + f_meth, :].astype(bf16)
    w1c = w1[f_cnv + f_meth:, :].astype(bf16)
    w2q = w2.astype(bf16)
    w3q = w3.astype(bf16)

    # Pad the final layer to a lane-dense output width (zero columns).
    w4p = jnp.zeros((w4.shape[0], _N_PAD), f32).at[:, :_N_OUT].set(w4).astype(bf16)
    b4p = jnp.zeros((1, _N_PAD), f32).at[:, :_N_OUT].set(b4)

    # Pack all biases into a single (1, 1792) f32 slab.
    bias = jnp.concatenate([b1, b2, b3, b4p], axis=1)

    prepped = (w1a, w1b, w1c, w2q, w3q, w4p, bias)
    return jax.tree_util.tree_map(jax.block_until_ready,
                                  jax.device_put(prepped))


# ---------------------------------------------------------------------------
# Per-call forward (jit-friendly; no weight prep inside).
# ---------------------------------------------------------------------------
def resnet50_mo_print_forward(image, CNV, meth, RNA, prepped):
    """Forward pass. `image` is unused (matches the PyTorch module)."""
    del image
    B = CNV.shape[0]
    w1a, w1b, w1c, w2q, w3q, w4p, bias = prepped

    vmem = lambda: pl.BlockSpec(memory_space=pltpu.MemorySpace.VMEM)

    out_padded = pl.pallas_call(
        _mlp_mo_kernel,
        out_shape=jax.ShapeDtypeStruct((B, _N_PAD), jnp.float32),
        in_specs=[vmem() for _ in range(10)],
        out_specs=vmem(),
    )(CNV, meth, RNA, w1a, w1b, w1c, w2q, w3q, w4p, bias)

    return out_padded[:, :_N_OUT]


def init_params(key, dim_moinput):
    """Deterministic parameter init; weights stored as (in, out), f32."""
    dims = [dim_moinput, _H1, _H2, _H3, _N_OUT]
    params = []
    keys = jax.random.split(key, len(dims) - 1)
    for k, d_in, d_out in zip(keys, dims[:-1], dims[1:]):
        kw, kb = jax.random.split(k)
        bound = 1.0 / jnp.sqrt(d_in)
        w = jax.random.uniform(kw, (d_in, d_out), jnp.float32, -bound, bound)
        b = jax.random.uniform(kb, (1, d_out), jnp.float32, -bound, bound)
        params += [w, b]
    return tuple(params)


def _reference(CNV, meth, RNA, params):
    """Pure-JAX reference matching the kernel numerics:
    bf16 activations x bf16 weights, f32 accumulate, f32 biases."""
    w1, b1, w2, b2, w3, b3, w4, b4 = params
    bf16, f32 = jnp.bfloat16, jnp.float32

    def mm(x, w):
        return jnp.dot(x.astype(bf16), w.astype(bf16), preferred_element_type=f32)

    x = jnp.concatenate([CNV, meth, RNA], axis=1)
    h = jnp.maximum(mm(x, w1) + b1, 0.0)
    h = jnp.maximum(mm(h, w2) + b2, 0.0)
    h = jnp.maximum(mm(h, w3) + b3, 0.0)
    return mm(h, w4) + b4


if __name__ == "__main__":
    key = jax.random.PRNGKey(0)
    k_img, k_cnv, k_meth, k_rna, k_par = jax.random.split(key, 5)

    # Small shapes consistent with the forward pass:
    # batch=8; CNV/meth/RNA each have 128 features -> dim_moinput = 384.
    B = 8
    f_cnv, f_meth, f_rna = 128, 128, 128
    dim_moinput = f_cnv + f_meth + f_rna

    image = jax.random.normal(k_img, (B, 3, 16, 16), jnp.float32)  # unused
    CNV = jax.random.normal(k_cnv, (B, f_cnv), jnp.float32)
    meth = jax.random.normal(k_meth, (B, f_meth), jnp.float32)
    RNA = jax.random.normal(k_rna, (B, f_rna), jnp.float32)

    params = init_params(k_par, dim_moinput)

    # One-time prep (hoisted out of the per-call path).
    prepped = prepare_params(params, f_cnv, f_meth)

    fwd = jax.jit(resnet50_mo_print_forward)
    out = fwd(image, CNV, meth, RNA, prepped)
    out = jax.block_until_ready(out)

    ref = _reference(CNV, meth, RNA, params)
    assert out.shape == (B, _N_OUT)
    err = float(jnp.max(jnp.abs(out - ref)))
    assert jnp.allclose(out, ref, atol=2e-3, rtol=2e-3), err

    print("KERNEL_OK")
</pallas_src>

<mosaic_0001>
module attributes {stable_mosaic.version = 11 : i64} {
  func.func @_mlp_mo_kernel(%arg0: memref<8x128xf32, #tpu.memory_space<vmem>>, %arg1: memref<8x128xf32, #tpu.memory_space<vmem>>, %arg2: memref<8x128xf32, #tpu.memory_space<vmem>>, %arg3: memref<128x1024xbf16, #tpu.memory_space<vmem>>, %arg4: memref<128x1024xbf16, #tpu.memory_space<vmem>>, %arg5: memref<128x1024xbf16, #tpu.memory_space<vmem>>, %arg6: memref<1024x512xbf16, #tpu.memory_space<vmem>>, %arg7: memref<512x128xbf16, #tpu.memory_space<vmem>>, %arg8: memref<128x128xbf16, #tpu.memory_space<vmem>>, %arg9: memref<1x1792xf32, #tpu.memory_space<vmem>>, %arg10: memref<8x128xf32, #tpu.memory_space<vmem>>) attributes {dimension_semantics = [], scalar_prefetch = 0 : i64, scratch_operands = 0 : i64, tpu.core_type = #tpu.core_type<tc>} {
    %c0 = arith.constant 0 : index
    %c0_0 = arith.constant 0 : index
    %0 = vector.load %arg9[%c0, %c0_0] : memref<1x1792xf32, #tpu.memory_space<vmem>>, vector<1x1024xf32>
    %c0_1 = arith.constant 0 : index
    %c1024 = arith.constant 1024 : index
    %1 = vector.load %arg9[%c0_1, %c1024] : memref<1x1792xf32, #tpu.memory_space<vmem>>, vector<1x512xf32>
    %c0_2 = arith.constant 0 : index
    %c1536 = arith.constant 1536 : index
    %2 = vector.load %arg9[%c0_2, %c1536] : memref<1x1792xf32, #tpu.memory_space<vmem>>, vector<1x128xf32>
    %c0_3 = arith.constant 0 : index
    %c1664 = arith.constant 1664 : index
    %3 = vector.load %arg9[%c0_3, %c1664] : memref<1x1792xf32, #tpu.memory_space<vmem>>, vector<1x128xf32>
    %c0_4 = arith.constant 0 : index
    %c0_5 = arith.constant 0 : index
    %4 = vector.load %arg0[%c0_4, %c0_5] : memref<8x128xf32, #tpu.memory_space<vmem>>, vector<8x128xf32>
    %5 = arith.truncf %4 : vector<8x128xf32> to vector<8x128xbf16>
    %c0_6 = arith.constant 0 : index
    %c0_7 = arith.constant 0 : index
    %6 = vector.load %arg3[%c0_6, %c0_7] : memref<128x1024xbf16, #tpu.memory_space<vmem>>, vector<128x1024xbf16>
    %cst = arith.constant dense<0.000000e+00> : vector<8x1024xf32>
    %7 = tpu.matmul %5, %6, %cst {dimension_numbers = #tpu.dot_dimension_numbers<[1], [0], [0], [1], [0, 0, 1, 1], [], []>} : vector<8x128xbf16>, vector<128x1024xbf16>, vector<8x1024xf32> -> vector<8x1024xf32>
    %c0_8 = arith.constant 0 : index
    %c0_9 = arith.constant 0 : index
    %8 = vector.load %arg1[%c0_8, %c0_9] : memref<8x128xf32, #tpu.memory_space<vmem>>, vector<8x128xf32>
    %9 = arith.truncf %8 : vector<8x128xf32> to vector<8x128xbf16>
    %c0_10 = arith.constant 0 : index
    %c0_11 = arith.constant 0 : index
    %10 = vector.load %arg4[%c0_10, %c0_11] : memref<128x1024xbf16, #tpu.memory_space<vmem>>, vector<128x1024xbf16>
    %cst_12 = arith.constant dense<0.000000e+00> : vector<8x1024xf32>
    %11 = tpu.matmul %9, %10, %cst_12 {dimension_numbers = #tpu.dot_dimension_numbers<[1], [0], [0], [1], [0, 0, 1, 1], [], []>} : vector<8x128xbf16>, vector<128x1024xbf16>, vector<8x1024xf32> -> vector<8x1024xf32>
    %12 = arith.addf %7, %11 : vector<8x1024xf32>
    %c0_13 = arith.constant 0 : index
    %c0_14 = arith.constant 0 : index
    %13 = vector.load %arg2[%c0_13, %c0_14] : memref<8x128xf32, #tpu.memory_space<vmem>>, vector<8x128xf32>
    %14 = arith.truncf %13 : vector<8x128xf32> to vector<8x128xbf16>
    %c0_15 = arith.constant 0 : index
    %c0_16 = arith.constant 0 : index
    %15 = vector.load %arg5[%c0_15, %c0_16] : memref<128x1024xbf16, #tpu.memory_space<vmem>>, vector<128x1024xbf16>
    %cst_17 = arith.constant dense<0.000000e+00> : vector<8x1024xf32>
    %16 = tpu.matmul %14, %15, %cst_17 {dimension_numbers = #tpu.dot_dimension_numbers<[1], [0], [0], [1], [0, 0, 1, 1], [], []>} : vector<8x128xbf16>, vector<128x1024xbf16>, vector<8x1024xf32> -> vector<8x1024xf32>
    %17 = arith.addf %12, %16 : vector<8x1024xf32>
    %18 = vector.broadcast %0 : vector<1x1024xf32> to vector<8x1024xf32>
    %19 = arith.addf %17, %18 : vector<8x1024xf32>
    %cst_18 = arith.constant 0.000000e+00 : f32
    %20 = vector.broadcast %cst_18 : f32 to vector<8x1024xf32>
    %21 = arith.maximumf %19, %20 : vector<8x1024xf32>
    %22 = arith.truncf %21 : vector<8x1024xf32> to vector<8x1024xbf16>
    %c0_19 = arith.constant 0 : index
    %c0_20 = arith.constant 0 : index
    %23 = vector.load %arg6[%c0_19, %c0_20] : memref<1024x512xbf16, #tpu.memory_space<vmem>>, vector<1024x512xbf16>
    %cst_21 = arith.constant dense<0.000000e+00> : vector<8x512xf32>
    %24 = tpu.matmul %22, %23, %cst_21 {dimension_numbers = #tpu.dot_dimension_numbers<[1], [0], [0], [1], [0, 0, 1, 1], [], []>} : vector<8x1024xbf16>, vector<1024x512xbf16>, vector<8x512xf32> -> vector<8x512xf32>
    %25 = vector.broadcast %1 : vector<1x512xf32> to vector<8x512xf32>
    %26 = arith.addf %24, %25 : vector<8x512xf32>
    %cst_22 = arith.constant 0.000000e+00 : f32
    %27 = vector.broadcast %cst_22 : f32 to vector<8x512xf32>
    %28 = arith.maximumf %26, %27 : vector<8x512xf32>
    %29 = arith.truncf %28 : vector<8x512xf32> to vector<8x512xbf16>
    %c0_23 = arith.constant 0 : index
    %c0_24 = arith.constant 0 : index
    %30 = vector.load %arg7[%c0_23, %c0_24] : memref<512x128xbf16, #tpu.memory_space<vmem>>, vector<512x128xbf16>
    %cst_25 = arith.constant dense<0.000000e+00> : vector<8x128xf32>
    %31 = tpu.matmul %29, %30, %cst_25 {dimension_numbers = #tpu.dot_dimension_numbers<[1], [0], [0], [1], [0, 0, 1, 1], [], []>} : vector<8x512xbf16>, vector<512x128xbf16>, vector<8x128xf32> -> vector<8x128xf32>
    %32 = vector.broadcast %2 : vector<1x128xf32> to vector<8x128xf32>
    %33 = arith.addf %31, %32 : vector<8x128xf32>
    %cst_26 = arith.constant 0.000000e+00 : f32
    %34 = vector.broadcast %cst_26 : f32 to vector<8x128xf32>
    %35 = arith.maximumf %33, %34 : vector<8x128xf32>
    %36 = arith.truncf %35 : vector<8x128xf32> to vector<8x128xbf16>
    %c0_27 = arith.constant 0 : index
    %c0_28 = arith.constant 0 : index
    %37 = vector.load %arg8[%c0_27, %c0_28] : memref<128x128xbf16, #tpu.memory_space<vmem>>, vector<128x128xbf16>
    %cst_29 = arith.constant dense<0.000000e+00> : vector<8x128xf32>
    %38 = tpu.matmul %36, %37, %cst_29 {dimension_numbers = #tpu.dot_dimension_numbers<[1], [0], [0], [1], [0, 0, 1, 1], [], []>} : vector<8x128xbf16>, vector<128x128xbf16>, vector<8x128xf32> -> vector<8x128xf32>
    %39 = vector.broadcast %3 : vector<1x128xf32> to vector<8x128xf32>
    %40 = arith.addf %38, %39 : vector<8x128xf32>
    %c0_30 = arith.constant 0 : index
    %c0_31 = arith.constant 0 : index
    %41 = vector.load %arg10[%c0_30, %c0_31] : memref<8x128xf32, #tpu.memory_space<vmem>>, vector<8x128xf32>
    tpu.vector_store %arg10[%c0_30, %c0_31], %40 {strides = array<i32>} : memref<8x128xf32, #tpu.memory_space<vmem>>, vector<8x128xf32>,
    return
  }
}

</mosaic_0001>

<bundles_post_ra>
// kernel: resnet50_mo_print_forward.1
= control target key start
LH: loop header
LB: loop body
LE: loop exit
PB: predicated region body
PF: predicated region fallthrough
CT: control target
= control target key end

     0   :  { %15 = vsyncpa [#allocation3], 0  ;;  %s5707_s0 = inlined_call_operand.hbm [shape: f32[8,128], index: 0, kind: input, shape index: {}]   ;;  %s5708_s1 = inlined_call_operand.hbm [shape: f32[8,128], index: 1, kind: input, shape index: {}]   ;;  %s5709_s2 = inlined_call_operand.hbm [shape: f32[8,128], index: 2, kind: input, shape index: {}]   ;;  %s5710_s3 = inlined_call_operand.hbm [shape: bf16[128,1024], index: 3, kind: input, shape index: {}]   ;;  %s5711_s4 = inlined_call_operand.hbm [shape: bf16[128,1024], index: 4, kind: input, shape index: {}]   ;;  %s5712_s5 = inlined_call_operand.hbm [shape: bf16[128,1024], index: 5, kind: input, shape index: {}]   ;;  %s5713_s6 = inlined_call_operand.hbm [shape: bf16[1024,512], index: 6, kind: input, shape index: {}]   ;;  %s5714_s7 = inlined_call_operand.hbm [shape: bf16[512,128], index: 7, kind: input, shape index: {}]   ;;  %s5715_s8 = inlined_call_operand.hbm [shape: bf16[128,128], index: 8, kind: input, shape index: {}]   ;;  %s5716_s9 = inlined_call_operand.vmem [shape: f32[1,1792], index: 9, kind: input, shape index: {}]   ;;  %s5717_s10 = inlined_call_operand.vmem [shape: f32[8,128], index: 10, kind: output, shape index: {}]  }
   0x1   :  { %16 = vsyncpa [#allocation5], 0 }
   0x2   :  { %17 = vsyncpa [#allocation8], 0 }
   0x3   :  { %18 = vsyncpa [#allocation11], 0 }
   0x4   :  { %19 = vsyncpa [#allocation14], 0  ;;  %s5431_s13 = smov [#allocation4]   ;;  %s5432_s15 = smov [#allocation7]  }
   0x5   :  { %s36_s14 = sshll.u32 %s5431_s13, 4  ;;  %s55_s16 = sshll.u32 %s5432_s15, 4  ;;  %s37_s14 = int_to_ptr.vmem [resolvable:$true] %s36_s14  ;;  %s56_s16 = int_to_ptr.vmem [resolvable:$true] %s55_s16 }
   0x6   :  { %s5249_s17 = scalar_lea.vmem %s37_s14, 128  ;;  %p5254_p1 = scmp.lt.s32.totalorder %s37_s14, %s37_s14 }
   0x7   :  { %p5250_p0 = scmp.ne.s32.totalorder %s37_s14, %s5249_s17  ;;  %p5255_p2 = scmp.lt.s32.totalorder %s5249_s17, %s5249_s17 }
   0x9   :  { %p5256_p3 = por %p5255_p2, %p5254_p1 }
   0xb   :  { %p5257_p4 = pnand %p5256_p3, %p5250_p0 }
   0xd   :  { %5260 = shalt.err (!%p5257_p4)
}
   0xe   :  { %39 = dma.hbm_to_vmem [thread:$0]  %s5708_s1, 128, %s37_s14, [#allocation5]  }
   0xf   :  { %s5269_s20 = scalar_lea.vmem %s56_s16, 8192  ;;  %p5274_p6 = scmp.lt.s32.totalorder %s56_s16, %s56_s16 }
  0x10   :  { %p5270_p5 = scmp.ne.s32.totalorder %s56_s16, %s5269_s20  ;;  %p5275_p7 = scmp.lt.s32.totalorder %s5269_s20, %s5269_s20 }
  0x12   :  { %p5276_p8 = por %p5275_p7, %p5274_p6 }
  0x14   :  { %p5277_p9 = pnand %p5276_p8, %p5270_p5 }
  0x16   :  { %5280 = shalt.err (!%p5277_p9)
}
  0x17   :  { %s5433_s21 = smov 512   ;;  %s5434_s22 = smov 32  }
  0x18   :  { %61 = dma.hbm_to_vmem [thread:$0]  %s5710_s3, 8192, %s56_s16, [#allocation8], %s5433_s21, %s5433_s21, %s5434_s22  }
  0x19   :  { %s5435_s25 = smov [#allocation10]   ;;  %s5436_s27 = smov [#allocation13]  }
  0x1a   :  { %s79_s26 = sshll.u32 %s5435_s25, 4  ;;  %s103_s1 = sshll.u32 %s5436_s27, 4  ;;  %s80_s26 = int_to_ptr.vmem [resolvable:$true] %s79_s26  ;;  %s104_s1 = int_to_ptr.vmem [resolvable:$true] %s103_s1 }
  0x1b   :  { %s5289_s28 = scalar_lea.vmem %s80_s26, 8192  ;;  %p5294_p11 = scmp.lt.s32.totalorder %s80_s26, %s80_s26 }
  0x1c   :  { %p5290_p10 = scmp.ne.s32.totalorder %s80_s26, %s5289_s28  ;;  %p5295_p12 = scmp.lt.s32.totalorder %s5289_s28, %s5289_s28 }
  0x1e   :  { %p5296_p13 = por %p5295_p12, %p5294_p11 }
  0x20   :  { %p5297_p0 = pnand %p5296_p13, %p5290_p10 }
  0x22   :  { %5300 = shalt.err (!%p5297_p0)
}
  0x23   :  { %85 = dma.hbm_to_vmem [thread:$0]  %s5712_s5, 8192, %s80_s26, [#allocation11], %s5433_s21, %s5433_s21, %s5434_s22  }
  0x24   :  { %s5309_s3 = scalar_lea.vmem %s104_s1, 4096  ;;  %p5314_p2 = scmp.lt.s32.totalorder %s104_s1, %s104_s1 }
  0x25   :  { %p5310_p1 = scmp.ne.s32.totalorder %s104_s1, %s5309_s3  ;;  %p5315_p3 = scmp.lt.s32.totalorder %s5309_s3, %s5309_s3 }
  0x27   :  { %p5316_p4 = por %p5315_p3, %p5314_p2 }
  0x29   :  { %p5317_p5 = pnand %p5316_p4, %p5310_p1 }
  0x2b   :  { %5320 = shalt.err (!%p5317_p5)
}
  0x2c   :  { %s5437_s11 = smov 64   ;;  %s5438_s12 = smov 4  }
  0x2d   :  { %109 = dma.hbm_to_vmem [thread:$0]  %s5714_s7, 4096, %s104_s1, [#allocation14], %s5437_s11, %s5437_s11, %s5438_s12  }
  0x2e   :  { %s5439_s15 = smov [#allocation2]   ;;  %s5440_s17 = smov [#allocation6]  }
  0x2f   :  { %s26_s16 = sshll.u32 %s5439_s15, 4  ;;  %s46_s5 = sshll.u32 %s5440_s17, 4  ;;  %s27_s16 = int_to_ptr.vmem [resolvable:$true] %s26_s16  ;;  %s47_s5 = int_to_ptr.vmem [resolvable:$true] %s46_s5 }
  0x30   :  { %s5329_s18 = scalar_lea.vmem %s27_s16, 128  ;;  %p5334_p7 = scmp.lt.s32.totalorder %s27_s16, %s27_s16 }
  0x31   :  { %p5330_p6 = scmp.ne.s32.totalorder %s27_s16, %s5329_s18  ;;  %p5335_p8 = scmp.lt.s32.totalorder %s5329_s18, %s5329_s18 }
  0x33   :  { %p5336_p9 = por %p5335_p8, %p5334_p7 }
  0x35   :  { %p5337_p10 = pnand %p5336_p9, %p5330_p6 }
  0x37   :  { %5340 = shalt.err (!%p5337_p10)
}
  0x38   :  { %29 = dma.hbm_to_vmem [thread:$0]  %s5707_s0, 128, %s27_s16, [#allocation3]  }
  0x39   :  { %s5349_s23 = scalar_lea.vmem %s47_s5, 128  ;;  %p5354_p12 = scmp.lt.s32.totalorder %s47_s5, %s47_s5 }
  0x3a   :  { %p5350_p11 = scmp.ne.s32.totalorder %s47_s5, %s5349_s23  ;;  %p5355_p13 = scmp.lt.s32.totalorder %s5349_s23, %s5349_s23 }
  0x3c   :  { %p5356_p0 = por %p5355_p13, %p5354_p12 }
  0x3e   :  { %p5357_p1 = pnand %p5356_p0, %p5350_p11 }
  0x40   :  { %5360 = shalt.err (!%p5357_p1)
}
  0x41   :  { %49 = dma.hbm_to_vmem [thread:$0]  %s5709_s2, 128, %s47_s5, [#allocation5]  }
  0x42   :  { %s5441_s25 = smov [#allocation9]   ;;  %s5442_s27 = smov [#allocation12]  }
  0x43   :  { %s67_s26 = sshll.u32 %s5441_s25, 4  ;;  %s91_s1 = sshll.u32 %s5442_s27, 4  ;;  %s68_s26 = int_to_ptr.vmem [resolvable:$true] %s67_s26  ;;  %s92_s1 = int_to_ptr.vmem [resolvable:$true] %s91_s1 }
  0x44   :  { %s5369_s28 = scalar_lea.vmem %s68_s26, 8192  ;;  %p5374_p3 = scmp.lt.s32.totalorder %s68_s26, %s68_s26 }
  0x45   :  { %p5370_p2 = scmp.ne.s32.totalorder %s68_s26, %s5369_s28  ;;  %p5375_p4 = scmp.lt.s32.totalorder %s5369_s28, %s5369_s28 }
  0x47   :  { %p5376_p5 = por %p5375_p4, %p5374_p3 }
  0x49   :  { %p5377_p6 = pnand %p5376_p5, %p5370_p2 }
  0x4b   :  { %5380 = shalt.err (!%p5377_p6)
}
  0x4c   :  { %73 = dma.hbm_to_vmem [thread:$0]  %s5711_s4, 8192, %s68_s26, [#allocation8], %s5433_s21, %s5433_s21, %s5434_s22  }
  0x4d   :  { %s5389_s2 = scalar_lea.vmem %s92_s1, 32768  ;;  %p5394_p8 = scmp.lt.s32.totalorder %s92_s1, %s92_s1 }
  0x4e   :  { %p5390_p7 = scmp.ne.s32.totalorder %s92_s1, %s5389_s2  ;;  %p5395_p9 = scmp.lt.s32.totalorder %s5389_s2, %s5389_s2 }
  0x50   :  { %p5396_p10 = por %p5395_p9, %p5394_p8 }
  0x52   :  { %p5397_p11 = pnand %p5396_p10, %p5390_p7 }
  0x54   :  { %5400 = shalt.err (!%p5397_p11)
}
  0x55   :  { %s5443_s30 = smov 256   ;;  %s5444_s3 = smov 16  }
  0x56   :  { %97 = dma.hbm_to_vmem [thread:$0]  %s5713_s6, 32768, %s92_s1, [#allocation11], %s5443_s30, %s5443_s30, %s5444_s3  }
  0x57   :  { %s5445_s15 = smov [#allocation15]  }
  0x58   :  { %s115_s16 = sshll.u32 %s5445_s15, 4  ;;  %s116_s16 = int_to_ptr.vmem [resolvable:$true] %s115_s16 }
  0x59   :  { %s5409_s17 = scalar_lea.vmem %s116_s16, 1024  ;;  %p5414_p13 = scmp.lt.s32.totalorder %s116_s16, %s116_s16 }
  0x5a   :  { %p5410_p12 = scmp.ne.s32.totalorder %s116_s16, %s5409_s17  ;;  %p5415_p0 = scmp.lt.s32.totalorder %s5409_s17, %s5409_s17 }
  0x5c   :  { %p5416_p1 = por %p5415_p0, %p5414_p13 }
  0x5e   :  { %p5417_p2 = pnand %p5416_p1, %p5410_p12 }
  0x60   :  { %5420 = shalt.err (!%p5417_p2)
}
  0x61   :  { %121 = dma.hbm_to_vmem [thread:$0]  %s5715_s8, 1024, %s116_s16, [#allocation14], %s5437_s11, %s5437_s11, %s5438_s12  }
  0x62   :  { %5421 = dma.done.wait [#allocation3], 128  }
  0x63   :  { %5422 = vsyncadd [#allocation3], 4294967168 }
  0x64   :  { %5423 = dma.done.wait [#allocation5], 256  }
  0x65   :  { %5424 = vsyncadd [#allocation5], 4294967040 }
  0x66   :  { %5425 = dma.done.wait [#allocation8], 16384  }
  0x67   :  { %5426 = vsyncadd [#allocation8], 4294950912 }
  0x68   :  { %5427 = dma.done.wait [#allocation11], 40960  }
  0x69   :  { %5428 = vsyncadd [#allocation11], 4294926336 }
  0x6a   :  { %5429 = dma.done.wait [#allocation14], 5120  }
  0x6b   :  { %5430 = vsyncadd [#allocation14], 4294962176  ;;  %v5446_v0 = vmov 0   ;;  %v280_v1 = vld [vmem:[#allocation9 + $0x1c0] sm:$0xff]  ;;  %v281_v3 = vld [vmem:[#allocation9 + $0x1c8] sm:$0xff]  ;;  %vm5448_vm0 = vmmov 0  }
  0x6c   :  { %640 = vmatprep.mubr.bf16.mxu0 %v5446_v0  ;;  %681 = vmatprep.mubr.bf16.mxu1 %v5446_v0  ;;  %v284_v2 = vld [vmem:[#allocation9 + $0x1e0] sm:$0xff]  ;;  %v285_v5 = vld [vmem:[#allocation9 + $0x1e8] sm:$0xff]  ;;  %v282_v63 = vld [vmem:[#allocation9 + $0x1d0] sm:$0xff] }
  0x6d   :  { %v4293_v4 = vcombine.high %v280_v1, %v284_v2  ;;  %v4292_v6 = vcombine.low %v280_v1, %v284_v2  ;;  %v272_v7 = vld [vmem:[#allocation9 + $0x180] sm:$0xff]  ;;  %v4295_v9 = vcombine.high %v281_v3, %v285_v5  ;;  %v4294_v10 = vcombine.low %v281_v3, %v285_v5  ;;  %v273_v12 = vld [vmem:[#allocation9 + $0x188] sm:$0xff]  ;;  %v286_v1 = vld [vmem:[#allocation9 + $0x1f0] sm:$0xff] }
  0x6e   :  { %v276_v8 = vld [vmem:[#allocation9 + $0x1a0] sm:$0xff]  ;;  %v277_v13 = vld [vmem:[#allocation9 + $0x1a8] sm:$0xff]  ;;  %v283_v2 = vld [vmem:[#allocation9 + $0x1d8] sm:$0xff] }
  0x6f   :  { %v4285_v11 = vcombine.high %v272_v7, %v276_v8  ;;  %v264_v14 = vld [vmem:[#allocation9 + $0x140] sm:$0xff]  ;;  %608 = vmatprep.subr.bf16.mxu0 %v4293_v4  ;;  %v4287_v15 = vcombine.high %v273_v12, %v277_v13  ;;  %v265_v17 = vld [vmem:[#allocation9 + $0x148] sm:$0xff]  ;;  %649 = vmatprep.subr.bf16.mxu1 %v4295_v9  ;;  %v4284_v19 = vcombine.low %v272_v7, %v276_v8  ;;  %v287_v3 = vld [vmem:[#allocation9 + $0x1f8] sm:$0xff] }
  0x70   :  { %v268_v16 = vld [vmem:[#allocation9 + $0x160] sm:$0xff]  ;;  %v269_v18 = vld [vmem:[#allocation9 + $0x168] sm:$0xff]  ;;  %609 = vmatpush1.bf16.msra.mxu0 %v4292_v6  ;;  %650 = vmatpush1.bf16.msra.mxu1 %v4294_v10  ;;  %v4286_v20 = vcombine.low %v273_v12, %v277_v13  ;;  %v222_v5 = vld [vmem:[#allocation4] sm:$0xff]  ;;  %v4297_v7 = vcombine.high %v282_v63, %v286_v1  ;;  %v4299_v8 = vcombine.high %v283_v2, %v287_v3 }
  0x71   :  { %610 = vmatprep.subr.bf16.mxu0 %v4285_v11  ;;  %v4277_v21 = vcombine.high %v264_v14, %v268_v16  ;;  %651 = vmatprep.subr.bf16.mxu1 %v4287_v15  ;;  %v4279_v22 = vcombine.high %v265_v17, %v269_v18  ;;  %v256_v23 = vld [vmem:[#allocation9 + $0x100] sm:$0xff]  ;;  %v257_v25 = vld [vmem:[#allocation9 + $0x108] sm:$0xff]  ;;  %v4276_v27 = vcombine.low %v264_v14, %v268_v16  ;;  %v274_v9 = vld [vmem:[#allocation9 + $0x190] sm:$0xff] }
  0x72   :  { %v260_v24 = vld [vmem:[#allocation9 + $0x120] sm:$0xff]  ;;  %v261_v26 = vld [vmem:[#allocation9 + $0x128] sm:$0xff]  ;;  %v4278_v28 = vcombine.low %v265_v17, %v269_v18  ;;  %v278_v10 = vld [vmem:[#allocation9 + $0x1b0] sm:$0xff]  ;;  %v5548_v11 = vpack.c.bf16 %v222_v5, %v222_v5  ;;  %v4296_v14 = vcombine.low %v282_v63, %v286_v1  ;;  %v4298_v15 = vcombine.low %v283_v2, %v287_v3 }
  0x73   :  { %v4269_v29 = vcombine.high %v256_v23, %v260_v24  ;;  %v4271_v30 = vcombine.high %v257_v25, %v261_v26  ;;  %v248_v31 = vld [vmem:[#allocation9 + $0xc0] sm:$0xff]  ;;  %v249_v33 = vld [vmem:[#allocation9 + $0xc8] sm:$0xff]  ;;  %v4268_v35 = vcombine.low %v256_v23, %v260_v24  ;;  %v4270_v36 = vcombine.low %v257_v25, %v261_v26  ;;  %v275_v12 = vld [vmem:[#allocation9 + $0x198] sm:$0xff] }
  0x74   :  { %611 = vmatpush1.bf16.msra.mxu0 %v4284_v19  ;;  %652 = vmatpush1.bf16.msra.mxu1 %v4286_v20  ;;  %v252_v32 = vld [vmem:[#allocation9 + $0xe0] sm:$0xff]  ;;  %v253_v34 = vld [vmem:[#allocation9 + $0xe8] sm:$0xff]  ;;  %v279_v13 = vld [vmem:[#allocation9 + $0x1b8] sm:$0xff]  ;;  %v4289_v16 = vcombine.high %v274_v9, %v278_v10 }
  0x75   :  { %612 = vmatprep.subr.bf16.mxu0 %v4277_v21  ;;  %653 = vmatprep.subr.bf16.mxu1 %v4279_v22  ;;  %v4261_v37 = vcombine.high %v248_v31, %v252_v32  ;;  %v4263_v38 = vcombine.high %v249_v33, %v253_v34  ;;  %v240_v39 = vld [vmem:[#allocation9 + $0x80] sm:$0xff]  ;;  %v241_v41 = vld [vmem:[#allocation9 + $0x88] sm:$0xff]  ;;  %v4260_v43 = vcombine.low %v248_v31, %v252_v32  ;;  %v266_v18 = vld [vmem:[#allocation9 + $0x150] sm:$0xff] }
  0x76   :  { %v244_v40 = vld [vmem:[#allocation9 + $0xa0] sm:$0xff]  ;;  %v245_v42 = vld [vmem:[#allocation9 + $0xa8] sm:$0xff]  ;;  %v4262_v44 = vcombine.low %v249_v33, %v253_v34  ;;  %v4291_v17 = vcombine.high %v275_v12, %v279_v13  ;;  %v270_v19 = vld [vmem:[#allocation9 + $0x170] sm:$0xff]  ;;  %v4288_v22 = vcombine.low %v274_v9, %v278_v10  ;;  %v4290_v23 = vcombine.low %v275_v12, %v279_v13 }
  0x77   :  { %v4253_v45 = vcombine.high %v240_v39, %v244_v40  ;;  %v4255_v46 = vcombine.high %v241_v41, %v245_v42  ;;  %v232_v47 = vld [vmem:[#allocation9 + $0x40] sm:$0xff]  ;;  %v233_v49 = vld [vmem:[#allocation9 + $0x48] sm:$0xff]  ;;  %v4252_v51 = vcombine.low %v240_v39, %v244_v40  ;;  %v4254_v52 = vcombine.low %v241_v41, %v245_v42  ;;  %v267_v20 = vld [vmem:[#allocation9 + $0x158] sm:$0xff] }
  0x78   :  { %613 = vmatpush1.bf16.msra.mxu0 %v4276_v27  ;;  %654 = vmatpush1.bf16.msra.mxu1 %v4278_v28  ;;  %v236_v48 = vld [vmem:[#allocation9 + $0x60] sm:$0xff]  ;;  %v237_v50 = vld [vmem:[#allocation9 + $0x68] sm:$0xff]  ;;  %v271_v21 = vld [vmem:[#allocation9 + $0x178] sm:$0xff]  ;;  %v4281_v24 = vcombine.high %v266_v18, %v270_v19 }
  0x79   :  { %614 = vmatprep.subr.bf16.mxu0 %v4269_v29  ;;  %655 = vmatprep.subr.bf16.mxu1 %v4271_v30  ;;  %v4245_v53 = vcombine.high %v232_v47, %v236_v48  ;;  %v4247_v54 = vcombine.high %v233_v49, %v237_v50  ;;  %v224_v55 = vld [vmem:[#allocation9] sm:$0xff]  ;;  %v225_v57 = vld [vmem:[#allocation9 + $0x8] sm:$0xff]  ;;  %v4244_v59 = vcombine.low %v232_v47, %v236_v48  ;;  %v258_v26 = vld [vmem:[#allocation9 + $0x110] sm:$0xff] }
  0x7a   :  { %v228_v56 = vld [vmem:[#allocation9 + $0x20] sm:$0xff]  ;;  %v229_v58 = vld [vmem:[#allocation9 + $0x28] sm:$0xff]  ;;  %v4246_v60 = vcombine.low %v233_v49, %v237_v50  ;;  %v4283_v25 = vcombine.high %v267_v20, %v271_v21  ;;  %v262_v27 = vld [vmem:[#allocation9 + $0x130] sm:$0xff]  ;;  %v4280_v30 = vcombine.low %v266_v18, %v270_v19  ;;  %v4282_v31 = vcombine.low %v267_v20, %v271_v21 }
  0x7b   :  { %v4237_v61 = vcombine.high %v224_v55, %v228_v56  ;;  %v4239_v62 = vcombine.high %v225_v57, %v229_v58  ;;  %v4236_v4 = vcombine.low %v224_v55, %v228_v56  ;;  %v4238_v6 = vcombine.low %v225_v57, %v229_v58  ;;  %v259_v28 = vld [vmem:[#allocation9 + $0x118] sm:$0xff]  ;;  %v250_v34 = vld [vmem:[#allocation9 + $0xd0] sm:$0xff]  ;;  %v214_v3 = vld [vmem:[#allocation7 + $0x1c0] sm:$0xff] }
  0x7c   :  { %615 = vmatpush1.bf16.msra.mxu0 %v4268_v35  ;;  %656 = vmatpush1.bf16.msra.mxu1 %v4270_v36  ;;  %v263_v29 = vld [vmem:[#allocation9 + $0x138] sm:$0xff]  ;;  %v4273_v32 = vcombine.high %v258_v26, %v262_v27  ;;  %v254_v35 = vld [vmem:[#allocation9 + $0xf0] sm:$0xff]  ;;  %v215_v5 = vld [vmem:[#allocation7 + $0x1c8] sm:$0xff] }
  0x7d   :  { %616 = vmatprep.subr.bf16.mxu0 %v4261_v37  ;;  %657 = vmatprep.subr.bf16.mxu1 %v4263_v38  ;;  %v4275_v33 = vcombine.high %v259_v28, %v263_v29  ;;  %v251_v36 = vld [vmem:[#allocation9 + $0xd8] sm:$0xff]  ;;  %v4272_v38 = vcombine.low %v258_v26, %v262_v27  ;;  %v4274_v39 = vcombine.low %v259_v28, %v263_v29  ;;  %v242_v42 = vld [vmem:[#allocation9 + $0x90] sm:$0xff]  ;;  %v206_v12 = vld [vmem:[#allocation7 + $0x180] sm:$0xff] }
  0x7e   :  { %v255_v37 = vld [vmem:[#allocation9 + $0xf8] sm:$0xff]  ;;  %v4265_v40 = vcombine.high %v250_v34, %v254_v35  ;;  %v234_v50 = vld [vmem:[#allocation9 + $0x50] sm:$0xff]  ;;  %v210_v13 = vld [vmem:[#allocation7 + $0x1a0] sm:$0xff] }
  0x7f   :  { %v4267_v41 = vcombine.high %v251_v36, %v255_v37  ;;  %v4266_v47 = vcombine.low %v251_v36, %v255_v37  ;;  %v226_v58 = vld [vmem:[#allocation9 + $0x10] sm:$0xff]  ;;  %v202_v18 = vld [vmem:[#allocation7 + $0x160] sm:$0xff]  ;;  %v4349_v20 = vcombine.high %v206_v12, %v210_v13  ;;  %v199_v21 = vld [vmem:[#allocation7 + $0x148] sm:$0xff] }
  0x80   :  { %617 = vmatpush1.bf16.msra.mxu0 %v4260_v43  ;;  %658 = vmatpush1.bf16.msra.mxu1 %v4262_v44  ;;  %v246_v43 = vld [vmem:[#allocation9 + $0xb0] sm:$0xff]  ;;  %v243_v44 = vld [vmem:[#allocation9 + $0x98] sm:$0xff]  ;;  %v194_v26 = vld [vmem:[#allocation7 + $0x120] sm:$0xff] }
  0x81   :  { %618 = vmatprep.subr.bf16.mxu0 %v4253_v45  ;;  %659 = vmatprep.subr.bf16.mxu1 %v4255_v46  ;;  %v247_v45 = vld [vmem:[#allocation9 + $0xb8] sm:$0xff]  ;;  %v4264_v46 = vcombine.low %v250_v34, %v254_v35  ;;  %v4257_v48 = vcombine.high %v242_v42, %v246_v43  ;;  %v191_v29 = vld [vmem:[#allocation7 + $0x108] sm:$0xff] }
  0x82   :  { %v4259_v49 = vcombine.high %v243_v44, %v247_v45  ;;  %v4258_v55 = vcombine.low %v243_v44, %v247_v45  ;;  %v183_v36 = vld [vmem:[#allocation7 + $0xc8] sm:$0xff] }
  0x83   :  { %v187_v37 = vld [vmem:[#allocation7 + $0xe8] sm:$0xff] }
  0x84   :  { %619 = vmatpush1.bf16.msra.mxu0 %v4252_v51  ;;  %660 = vmatpush1.bf16.msra.mxu1 %v4254_v52  ;;  %v238_v51 = vld [vmem:[#allocation9 + $0x70] sm:$0xff]  ;;  %v235_v52 = vld [vmem:[#allocation9 + $0x58] sm:$0xff]  ;;  %v175_v44 = vld [vmem:[#allocation7 + $0x88] sm:$0xff] }
  0x85   :  { %620 = vmatprep.subr.bf16.mxu0 %v4245_v53  ;;  %661 = vmatprep.subr.bf16.mxu1 %v4247_v54  ;;  %v239_v53 = vld [vmem:[#allocation9 + $0x78] sm:$0xff]  ;;  %v4256_v54 = vcombine.low %v242_v42, %v246_v43  ;;  %v4249_v56 = vcombine.high %v234_v50, %v238_v51  ;;  %v179_v45 = vld [vmem:[#allocation7 + $0xa8] sm:$0xff] }
  0x86   :  { %v4251_v57 = vcombine.high %v235_v52, %v239_v53  ;;  %v4250_v63 = vcombine.low %v235_v52, %v239_v53  ;;  %v167_v52 = vld [vmem:[#allocation7 + $0x48] sm:$0xff] }
  0x87   :  { %v171_v53 = vld [vmem:[#allocation7 + $0x68] sm:$0xff] }
  0x88   :  { %621 = vmatpush1.bf16.msra.mxu0 %v4244_v59  ;;  %662 = vmatpush1.bf16.msra.mxu1 %v4246_v60  ;;  %v230_v59 = vld [vmem:[#allocation9 + $0x30] sm:$0xff]  ;;  %v227_v60 = vld [vmem:[#allocation9 + $0x18] sm:$0xff] }
  0x89   :  { %622 = vmatprep.subr.bf16.mxu0 %v4237_v61  ;;  %663 = vmatprep.subr.bf16.mxu1 %v4239_v62  ;;  %v231_v61 = vld [vmem:[#allocation9 + $0x38] sm:$0xff]  ;;  %v4248_v62 = vcombine.low %v234_v50, %v238_v51  ;;  %v4241_v1 = vcombine.high %v226_v58, %v230_v59  ;;  %v4326_v50 = vcombine.low %v183_v36, %v187_v37 }
  0x8a   :  { %v4243_v2 = vcombine.high %v227_v60, %v231_v61 }
  0x8c   :  { %623 = vmatpush1.bf16.msra.mxu0 %v4236_v4  ;;  %664 = vmatpush1.bf16.msra.mxu1 %v4238_v6  ;;  %v218_v4 = vld [vmem:[#allocation7 + $0x1e0] sm:$0xff]  ;;  %v219_v6 = vld [vmem:[#allocation7 + $0x1e8] sm:$0xff] }
  0x8d   :  { %690 = vmatprep.subr.bf16.mxu0 %v4297_v7  ;;  %731 = vmatprep.subr.bf16.mxu1 %v4299_v8  ;;  %v4240_v7 = vcombine.low %v226_v58, %v230_v59  ;;  %v4242_v8 = vcombine.low %v227_v60, %v231_v61  ;;  %v4357_v9 = vcombine.high %v214_v3, %v218_v4  ;;  %v159_v60 = vld [vmem:[#allocation7 + $0x8] sm:$0xff] }
  0x8e   :  { %v4359_v10 = vcombine.high %v215_v5, %v219_v6  ;;  %v4358_v19 = vcombine.low %v215_v5, %v219_v6  ;;  %v4318_v58 = vcombine.low %v175_v44, %v179_v45  ;;  %v163_v61 = vld [vmem:[#allocation7 + $0x28] sm:$0xff]  ;;  %v217_v5 = vld [vmem:[#allocation7 + $0x1d8] sm:$0xff] }
  0x8f   :  { %641 = vmatmul.mubr.bf16.vlgmr.msra.gmra.mxu0 %v5548_v11  ;;  %682 = vmatmul.mubr.bf16.vlgmr.msra.gmra.mxu1 %v5548_v11  ;;  %v221_v6 = vld [vmem:[#allocation7 + $0x1f8] sm:$0xff] }
  0x90   :  { %691 = vmatpush1.bf16.msra.mxu0 %v4296_v14  ;;  %732 = vmatpush1.bf16.msra.mxu1 %v4298_v15  ;;  %v207_v14 = vld [vmem:[#allocation7 + $0x188] sm:$0xff] }
  0x91   :  { %692 = vmatprep.subr.bf16.mxu0 %v4289_v16  ;;  %733 = vmatprep.subr.bf16.mxu1 %v4291_v17  ;;  %v211_v15 = vld [vmem:[#allocation7 + $0x1a8] sm:$0xff]  ;;  %v4356_v16 = vcombine.low %v214_v3, %v218_v4  ;;  %v198_v17 = vld [vmem:[#allocation7 + $0x140] sm:$0xff]  ;;  %v4310_v3 = vcombine.low %v167_v52, %v171_v53 }
  0x92   :  { %722 = vmatprep.mubr.bf16.mxu0 %v5446_v0  ;;  %763 = vmatprep.mubr.bf16.mxu1 %v5446_v0  ;;  %v4350_v27 = vcombine.low %v207_v14, %v211_v15  ;;  %v4341_v28 = vcombine.high %v198_v17, %v202_v18 }
  0x94   :  { %693 = vmatpush1.bf16.msra.mxu0 %v4288_v22  ;;  %734 = vmatpush1.bf16.msra.mxu1 %v4290_v23  ;;  %v203_v22 = vld [vmem:[#allocation7 + $0x168] sm:$0xff]  ;;  %v4351_v23 = vcombine.high %v207_v14, %v211_v15  ;;  %v209_v15 = vld [vmem:[#allocation7 + $0x198] sm:$0xff] }
  0x95   :  { %694 = vmatprep.subr.bf16.mxu0 %v4281_v24  ;;  %735 = vmatprep.subr.bf16.mxu1 %v4283_v25  ;;  %v4348_v24 = vcombine.low %v206_v12, %v210_v13  ;;  %v190_v25 = vld [vmem:[#allocation7 + $0x100] sm:$0xff]  ;;  %v4342_v34 = vcombine.low %v199_v21, %v203_v22  ;;  %v212_v12 = vld [vmem:[#allocation7 + $0x1b0] sm:$0xff]  ;;  %v4302_v13 = vcombine.low %v159_v60, %v163_v61 }
  0x96   :  { %v4333_v35 = vcombine.high %v190_v25, %v194_v26 }
  0x98   :  { %695 = vmatpush1.bf16.msra.mxu0 %v4280_v30  ;;  %736 = vmatpush1.bf16.msra.mxu1 %v4282_v31  ;;  %v195_v30 = vld [vmem:[#allocation7 + $0x128] sm:$0xff]  ;;  %v4343_v31 = vcombine.high %v199_v21, %v203_v22  ;;  %v204_v21 = vld [vmem:[#allocation7 + $0x170] sm:$0xff]  ;;  %v4362_v22 = vcombine.low %v217_v5, %v221_v6 }
  0x99   :  { %696 = vmatprep.subr.bf16.mxu0 %v4273_v32  ;;  %737 = vmatprep.subr.bf16.mxu1 %v4275_v33  ;;  %v4340_v32 = vcombine.low %v198_v17, %v202_v18  ;;  %v182_v33 = vld [vmem:[#allocation7 + $0xc0] sm:$0xff]  ;;  %v4334_v42 = vcombine.low %v191_v29, %v195_v30  ;;  %v4363_v17 = vcombine.high %v217_v5, %v221_v6 }
  0x9a   :  { %v1318_v5 = vld [vmem:[#allocation10 + $0x1e0] sm:$0xff] }
  0x9c   :  { %697 = vmatpush1.bf16.msra.mxu0 %v4272_v38  ;;  %738 = vmatpush1.bf16.msra.mxu1 %v4274_v39  ;;  %v4335_v38 = vcombine.high %v191_v29, %v195_v30  ;;  %v4332_v39 = vcombine.low %v190_v25, %v194_v26  ;;  %v205_v25 = vld [vmem:[#allocation7 + $0x178] sm:$0xff]  ;;  %v196_v29 = vld [vmem:[#allocation7 + $0x130] sm:$0xff] }
  0x9d   :  { %698 = vmatprep.subr.bf16.mxu0 %v4265_v40  ;;  %739 = vmatprep.subr.bf16.mxu1 %v4267_v41  ;;  %v174_v40 = vld [vmem:[#allocation7 + $0x80] sm:$0xff] }
  0x9e   :  { %v178_v41 = vld [vmem:[#allocation7 + $0xa0] sm:$0xff] }
  0x9f   :  { %v4317_v51 = vcombine.high %v174_v40, %v178_v41 }
  0xa0   :  { %699 = vmatpush1.bf16.msra.mxu0 %v4264_v46  ;;  %740 = vmatpush1.bf16.msra.mxu1 %v4266_v47  ;;  %v4327_v46 = vcombine.high %v183_v36, %v187_v37  ;;  %v188_v36 = vld [vmem:[#allocation7 + $0xf0] sm:$0xff] }
  0xa1   :  { %700 = vmatprep.subr.bf16.mxu0 %v4257_v48  ;;  %741 = vmatprep.subr.bf16.mxu1 %v4259_v49  ;;  %v166_v48 = vld [vmem:[#allocation7 + $0x40] sm:$0xff] }
  0xa2   :  { %v170_v49 = vld [vmem:[#allocation7 + $0x60] sm:$0xff] }
  0xa3   :  { %v4309_v59 = vcombine.high %v166_v48, %v170_v49 }
  0xa4   :  { %701 = vmatpush1.bf16.msra.mxu0 %v4256_v54  ;;  %742 = vmatpush1.bf16.msra.mxu1 %v4258_v55  ;;  %v4319_v54 = vcombine.high %v175_v44, %v179_v45  ;;  %v4316_v55 = vcombine.low %v174_v40, %v178_v41  ;;  %v189_v40 = vld [vmem:[#allocation7 + $0xf8] sm:$0xff]  ;;  %v180_v44 = vld [vmem:[#allocation7 + $0xb0] sm:$0xff] }
  0xa5   :  { %702 = vmatprep.subr.bf16.mxu0 %v4249_v56  ;;  %743 = vmatprep.subr.bf16.mxu1 %v4251_v57  ;;  %v158_v56 = vld [vmem:[#allocation7] sm:$0xff] }
  0xa6   :  { %v162_v57 = vld [vmem:[#allocation7 + $0x20] sm:$0xff] }
  0xa7   :  { %v4301_v4 = vcombine.high %v158_v56, %v162_v57 }
  0xa8   :  { %703 = vmatpush1.bf16.msra.mxu0 %v4248_v62  ;;  %744 = vmatpush1.bf16.msra.mxu1 %v4250_v63  ;;  %v4311_v62 = vcombine.high %v167_v52, %v171_v53  ;;  %v4308_v63 = vcombine.low %v166_v48, %v170_v49  ;;  %v181_v48 = vld [vmem:[#allocation7 + $0xb8] sm:$0xff]  ;;  %v172_v52 = vld [vmem:[#allocation7 + $0x70] sm:$0xff] }
  0xa9   :  { %704 = vmatprep.subr.bf16.mxu0 %v4241_v1  ;;  %745 = vmatprep.subr.bf16.mxu1 %v4243_v2  ;;  %v216_v1 = vld [vmem:[#allocation7 + $0x1d0] sm:$0xff] }
  0xaa   :  { %v220_v2 = vld [vmem:[#allocation7 + $0x1f0] sm:$0xff] }
  0xab   :  { %v4361_v14 = vcombine.high %v216_v1, %v220_v2 }
  0xac   :  { %705 = vmatpush1.bf16.msra.mxu0 %v4240_v7  ;;  %746 = vmatpush1.bf16.msra.mxu1 %v4242_v8  ;;  %v4303_v7 = vcombine.high %v159_v60, %v163_v61  ;;  %v156_v8 = vld [vmem:[#allocation2] sm:$0xff]  ;;  %v164_v60 = vld [vmem:[#allocation7 + $0x30] sm:$0xff] }
  0xad   :  { %1092 = vmatprep.subr.bf16.mxu0 %v4357_v9  ;;  %1133 = vmatprep.subr.bf16.mxu1 %v4359_v10  ;;  %v4300_v9 = vcombine.low %v158_v56, %v162_v57  ;;  %v208_v10 = vld [vmem:[#allocation7 + $0x190] sm:$0xff]  ;;  %v5558_v18 = vpack.c.bf16 %v156_v8, %v156_v8  ;;  %v173_v56 = vld [vmem:[#allocation7 + $0x78] sm:$0xff]  ;;  %v1315_v8 = vld [vmem:[#allocation10 + $0x1c8] sm:$0xff] }
  0xaf   :  { %723 = vmatmul.mubr.bf16.vlgmr.msra.gmra.mxu0 %v5548_v11  ;;  %764 = vmatmul.mubr.bf16.vlgmr.msra.gmra.mxu1 %v5548_v11  ;;  %v186_v11 = vld [vmem:[#allocation7 + $0xe0] sm:$0xff] }
  0xb0   :  { %1093 = vmatpush1.bf16.msra.mxu0 %v4356_v16  ;;  %1134 = vmatpush1.bf16.msra.mxu1 %v4358_v19  ;;  %v4325_v43 = vcombine.high %v182_v33, %v186_v11  ;;  %v4324_v47 = vcombine.low %v182_v33, %v186_v11  ;;  %v213_v16 = vld [vmem:[#allocation7 + $0x1b8] sm:$0xff]  ;;  %v4360_v19 = vcombine.low %v216_v1, %v220_v2 }
  0xb1   :  { %1094 = vmatprep.subr.bf16.mxu0 %v4349_v20  ;;  %1135 = vmatprep.subr.bf16.mxu1 %v4351_v23  ;;  %v200_v20 = vld [vmem:[#allocation7 + $0x150] sm:$0xff]  ;;  %v4353_v23 = vcombine.high %v208_v10, %v212_v12  ;;  %v4355_v26 = vcombine.high %v209_v15, %v213_v16  ;;  %v4354_v30 = vcombine.low %v209_v15, %v213_v16  ;;  %v197_v33 = vld [vmem:[#allocation7 + $0x138] sm:$0xff] }
  0xb2   :  { %1124 = vmatprep.mubr.bf16.mxu0 %v5446_v0  ;;  %1165 = vmatprep.mubr.bf16.mxu1 %v5446_v0  ;;  %v165_v1 = vld [vmem:[#allocation7 + $0x38] sm:$0xff] }
  0xb4   :  { %1095 = vmatpush1.bf16.msra.mxu0 %v4348_v24  ;;  %1136 = vmatpush1.bf16.msra.mxu1 %v4350_v27  ;;  %v201_v24 = vld [vmem:[#allocation7 + $0x158] sm:$0xff]  ;;  %v4352_v27 = vcombine.low %v208_v10, %v212_v12 }
  0xb5   :  { %1096 = vmatprep.subr.bf16.mxu0 %v4341_v28  ;;  %1137 = vmatprep.subr.bf16.mxu1 %v4343_v31  ;;  %v192_v28 = vld [vmem:[#allocation7 + $0x110] sm:$0xff]  ;;  %v4345_v31 = vcombine.high %v200_v20, %v204_v21  ;;  %v4347_v11 = vcombine.high %v201_v24, %v205_v25  ;;  %v4346_v37 = vcombine.low %v201_v24, %v205_v25 }
  0xb8   :  { %1097 = vmatpush1.bf16.msra.mxu0 %v4340_v32  ;;  %1138 = vmatpush1.bf16.msra.mxu1 %v4342_v34  ;;  %v193_v32 = vld [vmem:[#allocation7 + $0x118] sm:$0xff]  ;;  %v4344_v34 = vcombine.low %v200_v20, %v204_v21 }
  0xb9   :  { %1098 = vmatprep.subr.bf16.mxu0 %v4333_v35  ;;  %1139 = vmatprep.subr.bf16.mxu1 %v4335_v38  ;;  %v184_v35 = vld [vmem:[#allocation7 + $0xd0] sm:$0xff]  ;;  %v4337_v38 = vcombine.high %v192_v28, %v196_v29  ;;  %v4339_v41 = vcombine.high %v193_v32, %v197_v33  ;;  %v4338_v45 = vcombine.low %v193_v32, %v197_v33 }
  0xbc   :  { %1099 = vmatpush1.bf16.msra.mxu0 %v4332_v39  ;;  %1140 = vmatpush1.bf16.msra.mxu1 %v4334_v42  ;;  %v185_v39 = vld [vmem:[#allocation7 + $0xd8] sm:$0xff]  ;;  %v4336_v42 = vcombine.low %v192_v28, %v196_v29 }
  0xbd   :  { %1100 = vmatprep.subr.bf16.mxu0 %v4325_v43  ;;  %1141 = vmatprep.subr.bf16.mxu1 %v4327_v46  ;;  %v176_v43 = vld [vmem:[#allocation7 + $0x90] sm:$0xff]  ;;  %v4329_v46 = vcombine.high %v184_v35, %v188_v36  ;;  %v4331_v49 = vcombine.high %v185_v39, %v189_v40  ;;  %v4330_v53 = vcombine.low %v185_v39, %v189_v40  ;;  %v1283_v40 = vld [vmem:[#allocation10 + $0xc8] sm:$0xff] }
  0xc0   :  { %1101 = vmatpush1.bf16.msra.mxu0 %v4324_v47  ;;  %1142 = vmatpush1.bf16.msra.mxu1 %v4326_v50  ;;  %v177_v47 = vld [vmem:[#allocation7 + $0x98] sm:$0xff]  ;;  %v4328_v50 = vcombine.low %v184_v35, %v188_v36 }
  0xc1   :  { %1102 = vmatprep.subr.bf16.mxu0 %v4317_v51  ;;  %1143 = vmatprep.subr.bf16.mxu1 %v4319_v54  ;;  %v168_v51 = vld [vmem:[#allocation7 + $0x50] sm:$0xff]  ;;  %v4321_v54 = vcombine.high %v176_v43, %v180_v44  ;;  %v4323_v57 = vcombine.high %v177_v47, %v181_v48  ;;  %v4322_v61 = vcombine.low %v177_v47, %v181_v48  ;;  %v1275_v48 = vld [vmem:[#allocation10 + $0x88] sm:$0xff] }
  0xc4   :  { %1103 = vmatpush1.bf16.msra.mxu0 %v4316_v55  ;;  %1144 = vmatpush1.bf16.msra.mxu1 %v4318_v58  ;;  %v169_v55 = vld [vmem:[#allocation7 + $0x58] sm:$0xff]  ;;  %v4320_v58 = vcombine.low %v176_v43, %v180_v44  ;;  %v1274_v44 = vld [vmem:[#allocation10 + $0x80] sm:$0xff] }
  0xc5   :  { %1104 = vmatprep.subr.bf16.mxu0 %v4309_v59  ;;  %1145 = vmatprep.subr.bf16.mxu1 %v4311_v62  ;;  %v160_v59 = vld [vmem:[#allocation7 + $0x10] sm:$0xff]  ;;  %v4313_v62 = vcombine.high %v168_v51, %v172_v52  ;;  %v4315_v2 = vcombine.high %v169_v55, %v173_v56  ;;  %v4314_v6 = vcombine.low %v169_v55, %v173_v56  ;;  %v1267_v56 = vld [vmem:[#allocation10 + $0x48] sm:$0xff] }
  0xc6   :  { %v4304_v12 = vcombine.low %v160_v59, %v164_v60 }
  0xc8   :  { %1105 = vmatpush1.bf16.msra.mxu0 %v4308_v63  ;;  %1146 = vmatpush1.bf16.msra.mxu1 %v4310_v3  ;;  %v161_v63 = vld [vmem:[#allocation7 + $0x18] sm:$0xff]  ;;  %v4312_v3 = vcombine.low %v168_v51, %v172_v52  ;;  %v1266_v52 = vld [vmem:[#allocation10 + $0x40] sm:$0xff] }
  0xc9   :  { %1106 = vmatprep.subr.bf16.mxu0 %v4301_v4  ;;  %1147 = vmatprep.subr.bf16.mxu1 %v4303_v7  ;;  %v1314_v4 = vld [vmem:[#allocation10 + $0x1c0] sm:$0xff]  ;;  %v4305_v7 = vcombine.high %v160_v59, %v164_v60  ;;  %v4307_v10 = vcombine.high %v161_v63, %v165_v1  ;;  %v4306_v15 = vcombine.low %v161_v63, %v165_v1  ;;  %v1259_v1 = vld [vmem:[#allocation10 + $0x8] sm:$0xff] }
  0xca   :  { %v4421_v16 = vcombine.high %v1314_v4, %v1318_v5  ;;  %v4420_v21 = vcombine.low %v1314_v4, %v1318_v5  ;;  %v1258_v60 = vld [vmem:[#allocation10] sm:$0xff]  ;;  %v1316_v5 = vld [vmem:[#allocation10 + $0x1d0] sm:$0xff] }
  0xcc   :  { %1107 = vmatpush1.bf16.msra.mxu0 %v4300_v9  ;;  %1148 = vmatpush1.bf16.msra.mxu1 %v4302_v13  ;;  %v1319_v9 = vld [vmem:[#allocation10 + $0x1e8] sm:$0xff]  ;;  %v1306_v13 = vld [vmem:[#allocation10 + $0x180] sm:$0xff] }
  0xcd   :  { %1174 = vmatprep.subr.bf16.mxu0 %v4361_v14  ;;  %1215 = vmatprep.subr.bf16.mxu1 %v4363_v17  ;;  %v1310_v14 = vld [vmem:[#allocation10 + $0x1a0] sm:$0xff]  ;;  %v1307_v17 = vld [vmem:[#allocation10 + $0x188] sm:$0xff]  ;;  %v4423_v20 = vcombine.high %v1315_v8, %v1319_v9  ;;  %v4422_v24 = vcombine.low %v1315_v8, %v1319_v9  ;;  %v1317_v9 = vld [vmem:[#allocation10 + $0x1d8] sm:$0xff] }
  0xce   :  { %v4413_v25 = vcombine.high %v1306_v13, %v1310_v14  ;;  %v4412_v29 = vcombine.low %v1306_v13, %v1310_v14  ;;  %v1256_v13 = vld [vmem:[#allocation6] sm:$0xff] }
  0xcf   :  { %1125 = vmatmul.mubr.bf16.vlgmr.msra.gmra.mxu0 %v5558_v18  ;;  %1166 = vmatmul.mubr.bf16.vlgmr.msra.gmra.mxu1 %v5558_v18 }
  0xd0   :  { %1175 = vmatpush1.bf16.msra.mxu0 %v4360_v19  ;;  %1216 = vmatpush1.bf16.msra.mxu1 %v4362_v22  ;;  %v1311_v19 = vld [vmem:[#allocation10 + $0x1a8] sm:$0xff]  ;;  %v1298_v22 = vld [vmem:[#allocation10 + $0x140] sm:$0xff] }
  0xd1   :  { %1176 = vmatprep.subr.bf16.mxu0 %v4353_v23  ;;  %1217 = vmatprep.subr.bf16.mxu1 %v4355_v26  ;;  %v1302_v23 = vld [vmem:[#allocation10 + $0x160] sm:$0xff]  ;;  %v1299_v26 = vld [vmem:[#allocation10 + $0x148] sm:$0xff]  ;;  %v4415_v28 = vcombine.high %v1307_v17, %v1311_v19  ;;  %v4414_v32 = vcombine.low %v1307_v17, %v1311_v19 }
  0xd2   :  { %1206 = vmatprep.mubr.bf16.mxu0 %v5446_v0  ;;  %1247 = vmatprep.mubr.bf16.mxu1 %v5446_v0  ;;  %v4405_v33 = vcombine.high %v1298_v22, %v1302_v23  ;;  %v4404_v36 = vcombine.low %v1298_v22, %v1302_v23  ;;  %v5568_v23 = vpack.c.bf16 %v1256_v13, %v1256_v13  ;;  %v4819_v13 = vld [vmem:[#allocation12 + $0xe4] ss:$16 sps:$4 sm:$0xff]  }
  0xd4   :  { %1177 = vmatpush1.bf16.msra.mxu0 %v4352_v27  ;;  %1218 = vmatpush1.bf16.msra.mxu1 %v4354_v30  ;;  %v1303_v27 = vld [vmem:[#allocation10 + $0x168] sm:$0xff]  ;;  %v1290_v30 = vld [vmem:[#allocation10 + $0x100] sm:$0xff] }
  0xd5   :  { %1178 = vmatprep.subr.bf16.mxu0 %v4345_v31  ;;  %1219 = vmatprep.subr.bf16.mxu1 %v4347_v11  ;;  %v1294_v31 = vld [vmem:[#allocation10 + $0x120] sm:$0xff]  ;;  %v1291_v11 = vld [vmem:[#allocation10 + $0x108] sm:$0xff]  ;;  %v4407_v35 = vcombine.high %v1299_v26, %v1303_v27 }
  0xd6   :  { %v4397_v39 = vcombine.high %v1290_v30, %v1294_v31  ;;  %v4396_v43 = vcombine.low %v1290_v30, %v1294_v31  ;;  %v1305_v30 = vld [vmem:[#allocation10 + $0x178] sm:$0xff] }
  0xd8   :  { %1179 = vmatpush1.bf16.msra.mxu0 %v4344_v34  ;;  %1220 = vmatpush1.bf16.msra.mxu1 %v4346_v37  ;;  %v1295_v34 = vld [vmem:[#allocation10 + $0x128] sm:$0xff]  ;;  %v1282_v37 = vld [vmem:[#allocation10 + $0xc0] sm:$0xff] }
  0xd9   :  { %1180 = vmatprep.subr.bf16.mxu0 %v4337_v38  ;;  %1221 = vmatprep.subr.bf16.mxu1 %v4339_v41  ;;  %v4406_v38 = vcombine.low %v1299_v26, %v1303_v27  ;;  %v1287_v41 = vld [vmem:[#allocation10 + $0xe8] sm:$0xff]  ;;  %v1304_v26 = vld [vmem:[#allocation10 + $0x170] sm:$0xff] }
  0xdc   :  { %1181 = vmatpush1.bf16.msra.mxu0 %v4336_v42  ;;  %1222 = vmatpush1.bf16.msra.mxu1 %v4338_v45  ;;  %v4399_v42 = vcombine.high %v1291_v11, %v1295_v34  ;;  %v1278_v45 = vld [vmem:[#allocation10 + $0xa0] sm:$0xff] }
  0xdd   :  { %1182 = vmatprep.subr.bf16.mxu0 %v4329_v46  ;;  %1223 = vmatprep.subr.bf16.mxu1 %v4331_v49  ;;  %v4398_v46 = vcombine.low %v1291_v11, %v1295_v34  ;;  %v1279_v49 = vld [vmem:[#allocation10 + $0xa8] sm:$0xff]  ;;  %v4381_v55 = vcombine.high %v1274_v44, %v1278_v45  ;;  %v4380_v59 = vcombine.low %v1274_v44, %v1278_v45  ;;  %v1296_v11 = vld [vmem:[#allocation10 + $0x130] sm:$0xff]  ;;  %v1285_v44 = vld [vmem:[#allocation10 + $0xd8] sm:$0xff] }
  0xde   :  { %v1289_v45 = vld [vmem:[#allocation10 + $0xf8] sm:$0xff] }
  0xe0   :  { %1183 = vmatpush1.bf16.msra.mxu0 %v4328_v50  ;;  %1224 = vmatpush1.bf16.msra.mxu1 %v4330_v53  ;;  %v4391_v50 = vcombine.high %v1283_v40, %v1287_v41  ;;  %v1270_v53 = vld [vmem:[#allocation10 + $0x60] sm:$0xff] }
  0xe1   :  { %1184 = vmatprep.subr.bf16.mxu0 %v4321_v54  ;;  %1225 = vmatprep.subr.bf16.mxu1 %v4323_v57  ;;  %v4390_v54 = vcombine.low %v1283_v40, %v1287_v41  ;;  %v1271_v57 = vld [vmem:[#allocation10 + $0x68] sm:$0xff]  ;;  %v4373_v63 = vcombine.high %v1266_v52, %v1270_v53  ;;  %v4372_v4 = vcombine.low %v1266_v52, %v1270_v53  ;;  %v1281_v52 = vld [vmem:[#allocation10 + $0xb8] sm:$0xff] }
  0xe4   :  { %1185 = vmatpush1.bf16.msra.mxu0 %v4320_v58  ;;  %1226 = vmatpush1.bf16.msra.mxu1 %v4322_v61  ;;  %v4383_v58 = vcombine.high %v1275_v48, %v1279_v49  ;;  %v1262_v61 = vld [vmem:[#allocation10 + $0x20] sm:$0xff] }
  0xe5   :  { %1186 = vmatprep.subr.bf16.mxu0 %v4313_v62  ;;  %1227 = vmatprep.subr.bf16.mxu1 %v4315_v2  ;;  %v4382_v62 = vcombine.low %v1275_v48, %v1279_v49  ;;  %v1263_v2 = vld [vmem:[#allocation10 + $0x28] sm:$0xff]  ;;  %v4365_v8 = vcombine.high %v1258_v60, %v1262_v61  ;;  %v4364_v14 = vcombine.low %v1258_v60, %v1262_v61  ;;  %v1276_v49 = vld [vmem:[#allocation10 + $0x90] sm:$0xff] }
  0xe6   :  { %v4366_v17 = vcombine.low %v1259_v1, %v1263_v2 }
  0xe8   :  { %1187 = vmatpush1.bf16.msra.mxu0 %v4312_v3  ;;  %1228 = vmatpush1.bf16.msra.mxu1 %v4314_v6  ;;  %v4375_v3 = vcombine.high %v1267_v56, %v1271_v57  ;;  %v1320_v6 = vld [vmem:[#allocation10 + $0x1f0] sm:$0xff] }
  0xe9   :  { %1188 = vmatprep.subr.bf16.mxu0 %v4305_v7  ;;  %1229 = vmatprep.subr.bf16.mxu1 %v4307_v10  ;;  %v4374_v7 = vcombine.low %v1267_v56, %v1271_v57  ;;  %v1321_v10 = vld [vmem:[#allocation10 + $0x1f8] sm:$0xff]  ;;  %v4425_v19 = vcombine.high %v1316_v5, %v1320_v6  ;;  %v1272_v57 = vld [vmem:[#allocation10 + $0x70] sm:$0xff] }
  0xea   :  { %v4427_v22 = vcombine.high %v1317_v9, %v1321_v10  ;;  %v4426_v27 = vcombine.low %v1317_v9, %v1321_v10 }
  0xec   :  { %1189 = vmatpush1.bf16.msra.mxu0 %v4304_v12  ;;  %1230 = vmatpush1.bf16.msra.mxu1 %v4306_v15  ;;  %v4367_v12 = vcombine.high %v1259_v1, %v1263_v2  ;;  %v1308_v15 = vld [vmem:[#allocation10 + $0x190] sm:$0xff] }
  0xed   :  { %1642 = vmatprep.subr.bf16.mxu0 %v4421_v16  ;;  %1683 = vmatprep.subr.bf16.mxu1 %v4423_v20  ;;  %v1312_v16 = vld [vmem:[#allocation10 + $0x1b0] sm:$0xff]  ;;  %v1309_v20 = vld [vmem:[#allocation10 + $0x198] sm:$0xff] }
  0xef   :  { %1207 = vmatmul.mubr.bf16.vlgmr.msra.gmra.mxu0 %v5558_v18  ;;  %1248 = vmatmul.mubr.bf16.vlgmr.msra.gmra.mxu1 %v5558_v18  ;;  %v1286_v18 = vld [vmem:[#allocation10 + $0xe0] sm:$0xff] }
  0xf0   :  { %1643 = vmatpush1.bf16.msra.mxu0 %v4420_v21  ;;  %1684 = vmatpush1.bf16.msra.mxu1 %v4422_v24  ;;  %v4389_v47 = vcombine.high %v1282_v37, %v1286_v18  ;;  %v4388_v51 = vcombine.low %v1282_v37, %v1286_v18  ;;  %v1313_v21 = vld [vmem:[#allocation10 + $0x1b8] sm:$0xff]  ;;  %v4424_v24 = vcombine.low %v1316_v5, %v1320_v6 }
  0xf1   :  { %1644 = vmatprep.subr.bf16.mxu0 %v4413_v25  ;;  %1685 = vmatprep.subr.bf16.mxu1 %v4415_v28  ;;  %v1300_v25 = vld [vmem:[#allocation10 + $0x150] sm:$0xff]  ;;  %v4417_v28 = vcombine.high %v1308_v15, %v1312_v16  ;;  %v4419_v31 = vcombine.high %v1309_v20, %v1313_v21  ;;  %v4418_v34 = vcombine.low %v1309_v20, %v1313_v21  ;;  %v1297_v37 = vld [vmem:[#allocation10 + $0x138] sm:$0xff] }
  0xf2   :  { %1674 = vmatprep.mubr.bf16.mxu0 %v5446_v0  ;;  %1715 = vmatprep.mubr.bf16.mxu1 %v5446_v0  ;;  %v4823_v20 = vld [vmem:[#allocation12 + $0xc0] ss:$16 sps:$4 sm:$0xff]  }
  0xf3   :  { %v4826_v21 = vld [vmem:[#allocation12 + $0x2c0] ss:$16 sps:$4 sm:$0xff]  }
  0xf4   :  { %1645 = vmatpush1.bf16.msra.mxu0 %v4412_v29  ;;  %1686 = vmatpush1.bf16.msra.mxu1 %v4414_v32  ;;  %v1301_v29 = vld [vmem:[#allocation10 + $0x158] sm:$0xff]  ;;  %v4416_v32 = vcombine.low %v1308_v15, %v1312_v16  ;;  %v4817_v15 = vld [vmem:[#allocation12 + $0xe0] ss:$16 sps:$4 sm:$0xff]  }
  0xf5   :  { %1646 = vmatprep.subr.bf16.mxu0 %v4405_v33  ;;  %1687 = vmatprep.subr.bf16.mxu1 %v4407_v35  ;;  %v1292_v33 = vld [vmem:[#allocation10 + $0x110] sm:$0xff]  ;;  %v4409_v35 = vcombine.high %v1300_v25, %v1304_v26  ;;  %v4411_v18 = vcombine.high %v1301_v29, %v1305_v30 }
  0xf6   :  { %v4401_v40 = vcombine.high %v1292_v33, %v1296_v11  ;;  %v4820_v16 = vld [vmem:[#allocation12 + $0x2e0] ss:$16 sps:$4 sm:$0xff]  }
  0xf8   :  { %1647 = vmatpush1.bf16.msra.mxu0 %v4404_v36  ;;  %1688 = vmatpush1.bf16.msra.mxu1 %v4406_v38  ;;  %v1293_v36 = vld [vmem:[#allocation10 + $0x118] sm:$0xff]  ;;  %v4408_v38 = vcombine.low %v1300_v25, %v1304_v26  ;;  %v4829_v25 = vld [vmem:[#allocation12 + $0xa0] ss:$16 sps:$4 sm:$0xff]  }
  0xf9   :  { %1648 = vmatprep.subr.bf16.mxu0 %v4397_v39  ;;  %1689 = vmatprep.subr.bf16.mxu1 %v4399_v42  ;;  %v4410_v39 = vcombine.low %v1301_v29, %v1305_v30  ;;  %v4403_v41 = vcombine.high %v1293_v36, %v1297_v37  ;;  %v1284_v42 = vld [vmem:[#allocation10 + $0xd0] sm:$0xff] }
  0xfa   :  { %v4832_v26 = vld [vmem:[#allocation12 + $0x2a0] ss:$16 sps:$4 sm:$0xff]   ;;  %v4843_v30 = vld [vmem:[#allocation12 + $0x64] ss:$16 sps:$4 sm:$0xff]  }
  0xfb   :  { %v4835_v29 = vld [vmem:[#allocation12 + $0x80] ss:$16 sps:$4 sm:$0xff]  }
  0xfc   :  { %1649 = vmatpush1.bf16.msra.mxu0 %v4396_v43  ;;  %1690 = vmatpush1.bf16.msra.mxu1 %v4398_v46  ;;  %v1288_v43 = vld [vmem:[#allocation10 + $0xf0] sm:$0xff]  ;;  %v4400_v46 = vcombine.low %v1292_v33, %v1296_v11 }
  0xfd   :  { %1650 = vmatprep.subr.bf16.mxu0 %v4389_v47  ;;  %1691 = vmatprep.subr.bf16.mxu1 %v4391_v50  ;;  %v4402_v47 = vcombine.low %v1293_v36, %v1297_v37  ;;  %v4393_v48 = vcombine.high %v1284_v42, %v1288_v43  ;;  %v1280_v50 = vld [vmem:[#allocation10 + $0xb0] sm:$0xff]  ;;  %v4392_v53 = vcombine.low %v1284_v42, %v1288_v43 }
  0xfe   :  { %v4385_v56 = vcombine.high %v1276_v49, %v1280_v50  ;;  %v4384_v61 = vcombine.low %v1276_v49, %v1280_v50  ;;  %v4844_v33 = vld [vmem:[#allocation12 + $0x260] ss:$16 sps:$4 sm:$0xff]   ;;  %v4849_v11 = vld [vmem:[#allocation12 + $0x44] ss:$16 sps:$4 sm:$0xff]  }
  0xff   :  { %v4850_v36 = vld [vmem:[#allocation12 + $0x240] ss:$16 sps:$4 sm:$0xff]   ;;  %v4855_v37 = vld [vmem:[#allocation12 + $0x24] ss:$16 sps:$4 sm:$0xff]  }
 0x100   :  { %1651 = vmatpush1.bf16.msra.mxu0 %v4388_v51  ;;  %1692 = vmatpush1.bf16.msra.mxu1 %v4390_v54  ;;  %v1277_v51 = vld [vmem:[#allocation10 + $0x98] sm:$0xff]  ;;  %v1268_v54 = vld [vmem:[#allocation10 + $0x50] sm:$0xff] }
 0x101   :  { %1652 = vmatprep.subr.bf16.mxu0 %v4381_v55  ;;  %1693 = vmatprep.subr.bf16.mxu1 %v4383_v58  ;;  %v4394_v55 = vcombine.low %v1285_v44, %v1289_v45  ;;  %v1269_v58 = vld [vmem:[#allocation10 + $0x58] sm:$0xff]  ;;  %v4387_v60 = vcombine.high %v1277_v51, %v1281_v52  ;;  %v4386_v1 = vcombine.low %v1277_v51, %v1281_v52  ;;  %v4859_v42 = vld [vmem:[#allocation12] ss:$16 sps:$4 sm:$0xff]  }
 0x102   :  { %v4377_v2 = vcombine.high %v1268_v54, %v1272_v57  ;;  %v4376_v6 = vcombine.low %v1268_v54, %v1272_v57  ;;  %v4862_v43 = vld [vmem:[#allocation12 + $0x200] ss:$16 sps:$4 sm:$0xff]   ;;  %v4879_v54 = vld [vmem:[#allocation12 + $0x1a4] ss:$16 sps:$4 sm:$0xff]  }
 0x103   :  { %v4871_v51 = vld [vmem:[#allocation12 + $0x1c0] ss:$16 sps:$4 sm:$0xff]  }
 0x104   :  { %1653 = vmatpush1.bf16.msra.mxu0 %v4380_v59  ;;  %1694 = vmatpush1.bf16.msra.mxu1 %v4382_v62  ;;  %v1273_v59 = vld [vmem:[#allocation10 + $0x78] sm:$0xff]  ;;  %v1260_v62 = vld [vmem:[#allocation10 + $0x10] sm:$0xff] }
 0x105   :  { %1654 = vmatprep.subr.bf16.mxu0 %v4373_v63  ;;  %1695 = vmatprep.subr.bf16.mxu1 %v4375_v3  ;;  %v1264_v63 = vld [vmem:[#allocation10 + $0x30] sm:$0xff]  ;;  %v1261_v3 = vld [vmem:[#allocation10 + $0x18] sm:$0xff]  ;;  %v4379_v5 = vcombine.high %v1269_v58, %v1273_v59 }
 0x106   :  { %v4368_v10 = vcombine.low %v1260_v62, %v1264_v63 }
 0x108   :  { %1655 = vmatpush1.bf16.msra.mxu0 %v4372_v4  ;;  %1696 = vmatpush1.bf16.msra.mxu1 %v4374_v7  ;;  %v1265_v4 = vld [vmem:[#allocation10 + $0x38] sm:$0xff]  ;;  %v4378_v7 = vcombine.low %v1269_v58, %v1273_v59  ;;  %v4877_v59 = vld [vmem:[#allocation12 + $0x1a0] ss:$16 sps:$4 sm:$0xff]  }
 0x109   :  { %1656 = vmatprep.subr.bf16.mxu0 %v4365_v8  ;;  %1697 = vmatprep.subr.bf16.mxu1 %v4367_v12  ;;  %v4369_v8 = vcombine.high %v1260_v62, %v1264_v63  ;;  %v4371_v9 = vcombine.high %v1261_v3, %v1265_v4  ;;  %v4370_v12 = vcombine.low %v1261_v3, %v1265_v4  ;;  %v4885_v62 = vld [vmem:[#allocation12 + $0x184] ss:$16 sps:$4 sm:$0xff]   ;;  %v4886_v3 = vld [vmem:[#allocation12 + $0x380] ss:$16 sps:$4 sm:$0xff]  }
 0x10a   :  { %v4891_v4 = vld [vmem:[#allocation12 + $0x164] ss:$16 sps:$4 sm:$0xff]  }
 0x10c   :  { %1657 = vmatpush1.bf16.msra.mxu0 %v4364_v14  ;;  %1698 = vmatpush1.bf16.msra.mxu1 %v4366_v17  ;;  %v4822_v14 = vld [vmem:[#allocation12 + $0x2e4] ss:$16 sps:$4 sm:$0xff]  }
 0x10d   :  { %1724 = vmatprep.subr.bf16.mxu0 %v4425_v19  ;;  %1765 = vmatprep.subr.bf16.mxu1 %v4427_v22  ;;  %v4825_v17 = vld [vmem:[#allocation12 + $0xc4] ss:$16 sps:$4 sm:$0xff]  }
 0x10e   :  { %v4828_v19 = vld [vmem:[#allocation12 + $0x2c4] ss:$16 sps:$4 sm:$0xff]  }
 0x10f   :  { %1675 = vmatmul.mubr.bf16.vlgmr.msra.gmra.mxu0 %v5568_v23  ;;  %1716 = vmatmul.mubr.bf16.vlgmr.msra.gmra.mxu1 %v5568_v23  ;;  %v4831_v22 = vld [vmem:[#allocation12 + $0xa4] ss:$16 sps:$4 sm:$0xff]  }
 0x110   :  { %1725 = vmatpush1.bf16.msra.mxu0 %v4424_v24  ;;  %1766 = vmatpush1.bf16.msra.mxu1 %v4426_v27  ;;  %v4834_v24 = vld [vmem:[#allocation12 + $0x2a4] ss:$16 sps:$4 sm:$0xff]  }
 0x111   :  { %1726 = vmatprep.subr.bf16.mxu0 %v4417_v28  ;;  %1767 = vmatprep.subr.bf16.mxu1 %v4419_v31  ;;  %v4837_v27 = vld [vmem:[#allocation12 + $0x84] ss:$16 sps:$4 sm:$0xff]  }
 0x112   :  { %1756 = vmatprep.mubr.bf16.mxu0 %v5446_v0  ;;  %1797 = vmatprep.mubr.bf16.mxu1 %v5446_v0  ;;  %v4395_v0 = vcombine.high %v1285_v44, %v1289_v45  ;;  %v4840_v28 = vld [vmem:[#allocation12 + $0x284] ss:$16 sps:$4 sm:$0xff]  }
 0x113   :  { %v4846_v31 = vld [vmem:[#allocation12 + $0x264] ss:$16 sps:$4 sm:$0xff]  }
 0x114   :  { %1727 = vmatpush1.bf16.msra.mxu0 %v4416_v32  ;;  %1768 = vmatpush1.bf16.msra.mxu1 %v4418_v34  ;;  %v4841_v32 = vld [vmem:[#allocation12 + $0x60] ss:$16 sps:$4 sm:$0xff]   ;;  %v4852_v34 = vld [vmem:[#allocation12 + $0x244] ss:$16 sps:$4 sm:$0xff]  }
 0x115   :  { %1728 = vmatprep.subr.bf16.mxu0 %v4409_v35  ;;  %1769 = vmatprep.subr.bf16.mxu1 %v4411_v18  ;;  %v4847_v35 = vld [vmem:[#allocation12 + $0x40] ss:$16 sps:$4 sm:$0xff]   ;;  %v4858_v18 = vld [vmem:[#allocation12 + $0x224] ss:$16 sps:$4 sm:$0xff]  }
 0x116   :  { %v4867_v44 = vld [vmem:[#allocation12 + $0x1e4] ss:$16 sps:$4 sm:$0xff]  }
 0x117   :  { %v4870_v45 = vld [vmem:[#allocation12 + $0x3e4] ss:$16 sps:$4 sm:$0xff]  }
 0x118   :  { %1729 = vmatpush1.bf16.msra.mxu0 %v4408_v38  ;;  %1770 = vmatpush1.bf16.msra.mxu1 %v4410_v39  ;;  %v4853_v38 = vld [vmem:[#allocation12 + $0x20] ss:$16 sps:$4 sm:$0xff]  }
 0x119   :  { %1730 = vmatprep.subr.bf16.mxu0 %v4401_v40  ;;  %1771 = vmatprep.subr.bf16.mxu1 %v4403_v41  ;;  %v4856_v39 = vld [vmem:[#allocation12 + $0x220] ss:$16 sps:$4 sm:$0xff]   ;;  %v4861_v40 = vld [vmem:[#allocation12 + $0x4] ss:$16 sps:$4 sm:$0xff]  }
 0x11a   :  { %v4864_v41 = vld [vmem:[#allocation12 + $0x204] ss:$16 sps:$4 sm:$0xff]  }
 0x11c   :  { %1731 = vmatpush1.bf16.msra.mxu0 %v4400_v46  ;;  %1772 = vmatpush1.bf16.msra.mxu1 %v4402_v47  ;;  %v4865_v46 = vld [vmem:[#allocation12 + $0x1e0] ss:$16 sps:$4 sm:$0xff]  }
 0x11d   :  { %1732 = vmatprep.subr.bf16.mxu0 %v4393_v48  ;;  %1773 = vmatprep.subr.bf16.mxu1 %v4395_v0  ;;  %v4868_v47 = vld [vmem:[#allocation12 + $0x3e0] ss:$16 sps:$4 sm:$0xff]   ;;  %v4873_v48 = vld [vmem:[#allocation12 + $0x1c4] ss:$16 sps:$4 sm:$0xff]  }
 0x11e   :  { %v4876_v0 = vld [vmem:[#allocation12 + $0x3c4] ss:$16 sps:$4 sm:$0xff]  }
 0x120   :  { %1733 = vmatpush1.bf16.msra.mxu0 %v4392_v53  ;;  %1774 = vmatpush1.bf16.msra.mxu1 %v4394_v55  ;;  %v4874_v53 = vld [vmem:[#allocation12 + $0x3c0] ss:$16 sps:$4 sm:$0xff]  }
 0x121   :  { %1734 = vmatprep.subr.bf16.mxu0 %v4385_v56  ;;  %1775 = vmatprep.subr.bf16.mxu1 %v4387_v60  ;;  %v4882_v56 = vld [vmem:[#allocation12 + $0x3a4] ss:$16 sps:$4 sm:$0xff]  }
 0x124   :  { %1735 = vmatpush1.bf16.msra.mxu0 %v4384_v61  ;;  %1776 = vmatpush1.bf16.msra.mxu1 %v4386_v1  ;;  %v4880_v61 = vld [vmem:[#allocation12 + $0x3a0] ss:$16 sps:$4 sm:$0xff]   ;;  %v4888_v1 = vld [vmem:[#allocation12 + $0x384] ss:$16 sps:$4 sm:$0xff]  }
 0x125   :  { %1736 = vmatprep.subr.bf16.mxu0 %v4377_v2  ;;  %1777 = vmatprep.subr.bf16.mxu1 %v4379_v5  ;;  %v4883_v2 = vld [vmem:[#allocation12 + $0x180] ss:$16 sps:$4 sm:$0xff]   ;;  %v4894_v5 = vld [vmem:[#allocation12 + $0x364] ss:$16 sps:$4 sm:$0xff]  }
 0x128   :  { %1737 = vmatpush1.bf16.msra.mxu0 %v4376_v6  ;;  %1778 = vmatpush1.bf16.msra.mxu1 %v4378_v7  ;;  %v4889_v6 = vld [vmem:[#allocation12 + $0x160] ss:$16 sps:$4 sm:$0xff]  }
 0x129   :  { %1738 = vmatprep.subr.bf16.mxu0 %v4369_v8  ;;  %1779 = vmatprep.subr.bf16.mxu1 %v4371_v9  ;;  %v4892_v7 = vld [vmem:[#allocation12 + $0x360] ss:$16 sps:$4 sm:$0xff]   ;;  %v4897_v8 = vld [vmem:[#allocation12 + $0x144] ss:$16 sps:$4 sm:$0xff]  }
 0x12a   :  { %v4900_v9 = vld [vmem:[#allocation12 + $0x344] ss:$16 sps:$4 sm:$0xff]  }
 0x12c   :  { %1739 = vmatpush1.bf16.msra.mxu0 %v4368_v10  ;;  %1780 = vmatpush1.bf16.msra.mxu1 %v4370_v12  ;;  %v4895_v10 = vld [vmem:[#allocation12 + $0x140] ss:$16 sps:$4 sm:$0xff]  }
 0x12d   :  { %3436 = vmatprep.subr.bf16.mxu0 %v4819_v13  ;;  %3477 = vmatprep.subr.bf16.mxu1 %v4822_v14  ;;  %v4898_v12 = vld [vmem:[#allocation12 + $0x340] ss:$16 sps:$4 sm:$0xff]   ;;  %v4903_v13 = vld [vmem:[#allocation12 + $0x124] ss:$16 sps:$4 sm:$0xff]  }
 0x12e   :  { %v4906_v14 = vld [vmem:[#allocation12 + $0x324] ss:$16 sps:$4 sm:$0xff]  }
 0x12f   :  { %1757 = vmatmul.mubr.bf16.vlgmr.msra.gmra.mxu0 %v5568_v23  ;;  %1798 = vmatmul.mubr.bf16.vlgmr.msra.gmra.mxu1 %v5568_v23  ;;  %v4838_v23 = vld [vmem:[#allocation12 + $0x280] ss:$16 sps:$4 sm:$0xff]  }
 0x130   :  { %3437 = vmatpush1.bf16.msra.mxu0 %v4817_v15  ;;  %3478 = vmatpush1.bf16.msra.mxu1 %v4820_v16  ;;  %v4901_v15 = vld [vmem:[#allocation12 + $0x120] ss:$16 sps:$4 sm:$0xff]  }
 0x131   :  { %3438 = vmatprep.subr.bf16.mxu0 %v4825_v17  ;;  %3479 = vmatprep.subr.bf16.mxu1 %v4828_v19  ;;  %v4904_v16 = vld [vmem:[#allocation12 + $0x320] ss:$16 sps:$4 sm:$0xff]   ;;  %v4909_v17 = vld [vmem:[#allocation12 + $0x104] ss:$16 sps:$4 sm:$0xff]  }
 0x132   :  { %v4912_v19 = vld [vmem:[#allocation12 + $0x304] ss:$16 sps:$4 sm:$0xff]  }
 0x134   :  { %3439 = vmatpush1.bf16.msra.mxu0 %v4823_v20  ;;  %3480 = vmatpush1.bf16.msra.mxu1 %v4826_v21  ;;  %v4907_v20 = vld [vmem:[#allocation12 + $0x100] ss:$16 sps:$4 sm:$0xff]  }
 0x135   :  { %3440 = vmatprep.subr.bf16.mxu0 %v4831_v22  ;;  %3481 = vmatprep.subr.bf16.mxu1 %v4834_v24  ;;  %v4910_v21 = vld [vmem:[#allocation12 + $0x300] ss:$16 sps:$4 sm:$0xff]   ;;  %v4915_v22 = vld [vmem:[#allocation12 + $0x4e4] ss:$16 sps:$4 sm:$0xff]   ;;  %v1815_v24 = vlaneseq }
 0x138   :  { %3441 = vmatpush1.bf16.msra.mxu0 %v4829_v25  ;;  %3482 = vmatpush1.bf16.msra.mxu1 %v4832_v26  ;;  %v4918_v25 = vld [vmem:[#allocation12 + $0x6e4] ss:$16 sps:$4 sm:$0xff]   ;;  %v5584_v26 = vshrl.u32 %v1815_v24, 7 }
 0x139   :  { %3442 = vmatprep.subr.bf16.mxu0 %v4837_v27  ;;  %3483 = vmatprep.subr.bf16.mxu1 %v4840_v28 }
 0x13c   :  { %3443 = vmatpush1.bf16.msra.mxu0 %v4835_v29  ;;  %3484 = vmatpush1.bf16.msra.mxu1 %v4838_v23  ;;  %v1833_v29 = vsub.s32 4, %v5584_v26  ;;  %v1841_v23 = vsub.s32 6, %v5584_v26 }
 0x13d   :  { %3444 = vmatprep.subr.bf16.mxu0 %v4843_v30  ;;  %3485 = vmatprep.subr.bf16.mxu1 %v4846_v31  ;;  %v5593_v31 = vld [vmem:[%s5716_s9] sm:$0xff] }
 0x140   :  { %3445 = vmatpush1.bf16.msra.mxu0 %v4841_v32  ;;  %3486 = vmatpush1.bf16.msra.mxu1 %v4844_v33  ;;  %v5598_v33 = vrot.slane %v5593_v31, %v1833_v29 }
 0x141   :  { %3446 = vmatprep.subr.bf16.mxu0 %v4849_v11  ;;  %3487 = vmatprep.subr.bf16.mxu1 %v4852_v34  ;;  %v5601_v11 = vrot.slane %v5593_v31, %v1841_v23 }
 0x144   :  { %3447 = vmatpush1.bf16.msra.mxu0 %v4847_v35  ;;  %3488 = vmatpush1.bf16.msra.mxu1 %v4850_v36 }
 0x145   :  { %3448 = vmatprep.subr.bf16.mxu0 %v4855_v37  ;;  %3489 = vmatprep.subr.bf16.mxu1 %v4858_v18 }
 0x148   :  { %3449 = vmatpush1.bf16.msra.mxu0 %v4853_v38  ;;  %3490 = vmatpush1.bf16.msra.mxu1 %v4856_v39 }
 0x149   :  { %3450 = vmatprep.subr.bf16.mxu0 %v4861_v40  ;;  %3491 = vmatprep.subr.bf16.mxu1 %v4864_v41 }
 0x14c   :  { %3451 = vmatpush1.bf16.msra.mxu0 %v4859_v42  ;;  %3492 = vmatpush1.bf16.msra.mxu1 %v4862_v43 }
 0x14d   :  { %3452 = vmatprep.subr.bf16.mxu0 %v4867_v44  ;;  %3493 = vmatprep.subr.bf16.mxu1 %v4870_v45 }
 0x14f   :  { %v5576_v49 = vpop.f32.mrf.mxu0  ;;  %v5578_v50 = vpop.f32.mrf.mxu1 }
 0x150   :  { %3453 = vmatpush2.bf16.msra.mxu0 %v4865_v46  ;;  %3494 = vmatpush2.bf16.msra.mxu1 %v4868_v47 }
 0x151   :  { %v5580_v52 = vpop.f32.mrf.mxu0  ;;  %3454 = vmatprep.subr.bf16.mxu0 %v4873_v48  ;;  %v5582_v55 = vpop.f32.mrf.mxu1  ;;  %3495 = vmatprep.subr.bf16.mxu1 %v4876_v0 }
 0x153   :  { %v646_v57 = vpop.f32.mrf.mxu0  ;;  %v687_v58 = vpop.f32.mrf.mxu1 }
 0x154   :  { %3455 = vmatpush2.bf16.msra.mxu0 %v4871_v51  ;;  %3496 = vmatpush2.bf16.msra.mxu1 %v4874_v53  ;;  %v1817_v58 = vsub.s32 0, %v5584_v26 }
 0x155   :  { %v647_v60 = vpop.f32.mrf.mxu0  ;;  %3456 = vmatprep.subr.bf16.mxu0 %v4879_v54  ;;  %v688_v63 = vpop.f32.mrf.mxu1  ;;  %3497 = vmatprep.subr.bf16.mxu1 %v4882_v56 }
 0x156   :  { %v1821_v60 = vsub.s32 1, %v5584_v26 }
 0x158   :  { %3457 = vmatpush2.bf16.msra.mxu0 %v4877_v59  ;;  %3498 = vmatpush2.bf16.msra.mxu1 %v4880_v61  ;;  %v1825_v59 = vsub.s32 2, %v5584_v26  ;;  %v1829_v61 = vsub.s32 3, %v5584_v26 }
 0x159   :  { %3458 = vmatprep.subr.bf16.mxu0 %v4885_v62  ;;  %3499 = vmatprep.subr.bf16.mxu1 %v4888_v1  ;;  %v1818_v62 = vrot.slane %v5593_v31, %v1817_v58 }
 0x15a   :  { %v1826_v1 = vrot.slane %v5593_v31, %v1825_v59 }
 0x15c   :  { %3459 = vmatpush2.bf16.msra.mxu0 %v4883_v2  ;;  %3500 = vmatpush2.bf16.msra.mxu1 %v4886_v3 }
 0x15d   :  { %3460 = vmatprep.subr.bf16.mxu0 %v4891_v4  ;;  %3501 = vmatprep.subr.bf16.mxu1 %v4894_v5  ;;  %v1822_v5 = vrot.slane %v5593_v31, %v1821_v60 }
 0x160   :  { %3461 = vmatpush2.bf16.msra.mxu0 %v4889_v6  ;;  %3502 = vmatpush2.bf16.msra.mxu1 %v4892_v7 }
 0x161   :  { %3462 = vmatprep.subr.bf16.mxu0 %v4897_v8  ;;  %3503 = vmatprep.subr.bf16.mxu1 %v4900_v9  ;;  %v1830_v9 = vrot.slane %v5593_v31, %v1829_v61 }
 0x164   :  { %3463 = vmatpush2.bf16.msra.mxu0 %v4895_v10  ;;  %3504 = vmatpush2.bf16.msra.mxu1 %v4898_v12 }
 0x165   :  { %3464 = vmatprep.subr.bf16.mxu0 %v4903_v13  ;;  %3505 = vmatprep.subr.bf16.mxu1 %v4906_v14 }
 0x168   :  { %3465 = vmatpush2.bf16.msra.mxu0 %v4901_v15  ;;  %3506 = vmatpush2.bf16.msra.mxu1 %v4904_v16 }
 0x169   :  { %3466 = vmatprep.subr.bf16.mxu0 %v4909_v17  ;;  %3507 = vmatprep.subr.bf16.mxu1 %v4912_v19 }
 0x16c   :  { %3467 = vmatpush2.bf16.msra.mxu0 %v4907_v20  ;;  %3508 = vmatpush2.bf16.msra.mxu1 %v4910_v21 }
 0x16d   :  { %3518 = vmatprep.subr.bf16.mxu0 %v4915_v22  ;;  %3559 = vmatprep.subr.bf16.mxu1 %v4918_v25 }
 0x16f   :  { %v724_v27 = vpop.f32.mrf.mxu0  ;;  %v765_v28 = vpop.f32.mrf.mxu1 }
 0x171   :  { %v5588_v30 = vpop.f32.mrf.mxu0  ;;  %v5595_v32 = vpop.f32.mrf.mxu1 }
 0x173   :  { %v728_v34 = vpop.f32.mrf.mxu0  ;;  %v769_v35 = vpop.f32.mrf.mxu1 }
 0x174   :  { %v4916_v34 = vld [vmem:[#allocation12 + $0x6e0] ss:$16 sps:$4 sm:$0xff]   ;;  %v4921_v35 = vld [vmem:[#allocation12 + $0x4c4] ss:$16 sps:$4 sm:$0xff]  }
 0x175   :  { %v729_v36 = vpop.f32.mrf.mxu0  ;;  %v770_v37 = vpop.f32.mrf.mxu1 }
 0x176   :  { %v4924_v37 = vld [vmem:[#allocation12 + $0x6c4] ss:$16 sps:$4 sm:$0xff]  }
 0x18f   :  { %v1126_v18 = vpop.f32.mrf.mxu0  ;;  %v1167_v39 = vpop.f32.mrf.mxu1 }
 0x190   :  { %v1127_v38 = vadd.f32 %v1126_v18, %v5576_v49  ;;  %v1168_v40 = vadd.f32 %v1167_v39, %v5578_v50  ;;  %v4919_v18 = vld [vmem:[#allocation12 + $0x4c0] ss:$16 sps:$4 sm:$0xff]   ;;  %v4927_v39 = vld [vmem:[#allocation12 + $0x4a4] ss:$16 sps:$4 sm:$0xff]  }
 0x191   :  { %v1128_v41 = vpop.f32.mrf.mxu0  ;;  %v1169_v42 = vpop.f32.mrf.mxu1 }
 0x192   :  { %v1129_v2 = vadd.f32 %v1128_v41, %v5580_v52  ;;  %v1170_v6 = vadd.f32 %v1169_v42, %v5582_v55  ;;  %v4925_v41 = vld [vmem:[#allocation12 + $0x4a0] ss:$16 sps:$4 sm:$0xff]  }
 0x193   :  { %v1130_v43 = vpop.f32.mrf.mxu0  ;;  %v1171_v44 = vpop.f32.mrf.mxu1  ;;  %v4928_v42 = vld [vmem:[#allocation12 + $0x6a0] ss:$16 sps:$4 sm:$0xff]  }
 0x194   :  { %v4933_v43 = vld [vmem:[#allocation12 + $0x484] ss:$16 sps:$4 sm:$0xff]  }
 0x195   :  { %v1131_v45 = vpop.f32.mrf.mxu0  ;;  %v1172_v46 = vpop.f32.mrf.mxu1  ;;  %v4936_v44 = vld [vmem:[#allocation12 + $0x684] ss:$16 sps:$4 sm:$0xff]  }
 0x196   :  { %v4931_v45 = vld [vmem:[#allocation12 + $0x480] ss:$16 sps:$4 sm:$0xff]  }
 0x197   :  { %v4934_v46 = vld [vmem:[#allocation12 + $0x680] ss:$16 sps:$4 sm:$0xff]  }
 0x1af   :  { %v1208_v47 = vpop.f32.mrf.mxu0  ;;  %v1249_v0 = vpop.f32.mrf.mxu1 }
 0x1b0   :  { %v5605_v48 = vadd.f32 %v1208_v47, %v724_v27  ;;  %v5607_v51 = vadd.f32 %v1249_v0, %v765_v28  ;;  %v4913_v28 = vld [vmem:[#allocation12 + $0x4e0] ss:$16 sps:$4 sm:$0xff]   ;;  %v4939_v47 = vld [vmem:[#allocation12 + $0x464] ss:$16 sps:$4 sm:$0xff]  }
 0x1b1   :  { %v5609_v53 = vpop.f32.mrf.mxu0  ;;  %v5611_v54 = vpop.f32.mrf.mxu1  ;;  %v4942_v0 = vld [vmem:[#allocation12 + $0x664] ss:$16 sps:$4 sm:$0xff]  }
 0x1b3   :  { %v1212_v49 = vpop.f32.mrf.mxu0  ;;  %v1253_v56 = vpop.f32.mrf.mxu1 }
 0x1b4   :  { %v4937_v49 = vld [vmem:[#allocation12 + $0x460] ss:$16 sps:$4 sm:$0xff]  }
 0x1b5   :  { %v1213_v57 = vpop.f32.mrf.mxu0  ;;  %v1254_v50 = vpop.f32.mrf.mxu1  ;;  %v4940_v56 = vld [vmem:[#allocation12 + $0x660] ss:$16 sps:$4 sm:$0xff]  }
 0x1b6   :  { %v4945_v57 = vld [vmem:[#allocation12 + $0x444] ss:$16 sps:$4 sm:$0xff]  }
 0x1b7   :  { %v4948_v50 = vld [vmem:[#allocation12 + $0x644] ss:$16 sps:$4 sm:$0xff]  }
 0x1cf   :  { %v1676_v63 = vpop.f32.mrf.mxu0  ;;  %v1717_v4 = vpop.f32.mrf.mxu1 }
 0x1d0   :  { %v1806_v3 = vadd.f32 %v1676_v63, %v1127_v38  ;;  %v1808_v7 = vadd.f32 %v1717_v4, %v1168_v40  ;;  %v4922_v38 = vld [vmem:[#allocation12 + $0x6c0] ss:$16 sps:$4 sm:$0xff]   ;;  %v4930_v40 = vld [vmem:[#allocation12 + $0x6a4] ss:$16 sps:$4 sm:$0xff]   ;;  %v1837_v63 = vsub.s32 5, %v5584_v26 }
 0x1d1   :  { %v1678_v8 = vpop.f32.mrf.mxu0  ;;  %v1719_v13 = vpop.f32.mrf.mxu1  ;;  %v4954_v4 = vld [vmem:[#allocation12 + $0x624] ss:$16 sps:$4 sm:$0xff]  }
 0x1d2   :  { %v1855_v10 = vadd.f32 %v1818_v62, %v1806_v3  ;;  %v1807_v12 = vadd.f32 %v1678_v8, %v1129_v2  ;;  %v1857_v14 = vadd.f32 %v1826_v1, %v1808_v7  ;;  %v1809_v15 = vadd.f32 %v1719_v13, %v1170_v6  ;;  %v4943_v62 = vld [vmem:[#allocation12 + $0x440] ss:$16 sps:$4 sm:$0xff]   ;;  %v4951_v3 = vld [vmem:[#allocation12 + $0x424] ss:$16 sps:$4 sm:$0xff]  }
 0x1d3   :  { %v1680_v52 = vpop.f32.mrf.mxu0  ;;  %v1721_v17 = vpop.f32.mrf.mxu1  ;;  %v4946_v1 = vld [vmem:[#allocation12 + $0x640] ss:$16 sps:$4 sm:$0xff]   ;;  %v1845_v2 = vsub.s32 7, %v5584_v26  ;;  %v1211_v6 = vadd.f32 %v5609_v53, %v5588_v30 }
 0x1d4   :  { %v1856_v16 = vadd.f32 %v1822_v5, %v1807_v12  ;;  %v1863_v19 = vmax.f32 %v1855_v10, 0.0  ;;  %v1858_v20 = vadd.f32 %v1830_v9, %v1809_v15  ;;  %v1865_v22 = vmax.f32 %v1857_v14, 0.0  ;;  %v4949_v10 = vld [vmem:[#allocation12 + $0x420] ss:$16 sps:$4 sm:$0xff]   ;;  %v4960_v17 = vld [vmem:[#allocation12 + $0x604] ss:$16 sps:$4 sm:$0xff]  }
 0x1d5   :  { %v1681_v21 = vpop.f32.mrf.mxu0  ;;  %v1722_v55 = vpop.f32.mrf.mxu1  ;;  %v1838_v9 = vrot.slane %v5593_v31, %v1837_v63  ;;  %v1252_v12 = vadd.f32 %v5611_v54, %v5595_v32  ;;  %v1846_v15 = vrot.slane %v5593_v31, %v1845_v2  ;;  %v4952_v52 = vld [vmem:[#allocation12 + $0x620] ss:$16 sps:$4 sm:$0xff]   ;;  %v4993_v63 = vld [vmem:[#allocation12 + $0x544] ss:$16 sps:$4 sm:$0xff]  }
 0x1d6   :  { %v1864_v24 = vmax.f32 %v1856_v16, 0.0  ;;  %v1866_v25 = vmax.f32 %v1858_v20, 0.0  ;;  %v5633_v29 = vpack.c.bf16 %v1863_v19, %v1863_v19  ;;  %v5637_v36 = vpack.c.bf16 %v1865_v22, %v1865_v22  ;;  %v4957_v16 = vld [vmem:[#allocation12 + $0x404] ss:$16 sps:$4 sm:$0xff]   ;;  %v4955_v20 = vld [vmem:[#allocation12 + $0x400] ss:$16 sps:$4 sm:$0xff]  }
 0x1d7   :  { %v4958_v22 = vld [vmem:[#allocation12 + $0x600] ss:$16 sps:$4 sm:$0xff]  }
 0x1d8   :  { %v5631_v27 = vpack.c.bf16 %v1864_v24, %v1864_v24  ;;  %v5635_v23 = vpack.c.bf16 %v1866_v25, %v1866_v25  ;;  %v4963_v24 = vld [vmem:[#allocation12 + $0x5e4] ss:$16 sps:$4 sm:$0xff]   ;;  %v4991_v2 = vld [vmem:[#allocation12 + $0x540] ss:$16 sps:$4 sm:$0xff]  }
 0x1d9   :  { %v4966_v25 = vld [vmem:[#allocation12 + $0x7e4] ss:$16 sps:$4 sm:$0xff]  }
 0x1da   :  { %3468 = vmatprep.mubr.bf16.mxu0 %v5631_v27  ;;  %3509 = vmatprep.mubr.bf16.mxu1 %v5635_v23 }
 0x1db   :  { %3469 = vmatmul.mubr.bf16.vlgmr.msra.gmra.mxu0 %v5633_v29  ;;  %3510 = vmatmul.mubr.bf16.vlgmr.msra.gmra.mxu1 %v5637_v36 }
 0x1dc   :  { %3519 = vmatpush1.bf16.msra.mxu0 %v4913_v28  ;;  %3560 = vmatpush1.bf16.msra.mxu1 %v4916_v34 }
 0x1dd   :  { %3520 = vmatprep.subr.bf16.mxu0 %v4921_v35  ;;  %3561 = vmatprep.subr.bf16.mxu1 %v4924_v37 }
 0x1e0   :  { %3521 = vmatpush1.bf16.msra.mxu0 %v4919_v18  ;;  %3562 = vmatpush1.bf16.msra.mxu1 %v4922_v38  ;;  %v4964_v18 = vld [vmem:[#allocation12 + $0x7e0] ss:$16 sps:$4 sm:$0xff]   ;;  %v4969_v38 = vld [vmem:[#allocation12 + $0x5c4] ss:$16 sps:$4 sm:$0xff]  }
 0x1e1   :  { %3522 = vmatprep.subr.bf16.mxu0 %v4927_v39  ;;  %3563 = vmatprep.subr.bf16.mxu1 %v4930_v40  ;;  %v4972_v39 = vld [vmem:[#allocation12 + $0x7c4] ss:$16 sps:$4 sm:$0xff]   ;;  %v4967_v40 = vld [vmem:[#allocation12 + $0x5c0] ss:$16 sps:$4 sm:$0xff]  }
 0x1e4   :  { %3523 = vmatpush1.bf16.msra.mxu0 %v4925_v41  ;;  %3564 = vmatpush1.bf16.msra.mxu1 %v4928_v42  ;;  %v4970_v41 = vld [vmem:[#allocation12 + $0x7c0] ss:$16 sps:$4 sm:$0xff]   ;;  %v4975_v42 = vld [vmem:[#allocation12 + $0x5a4] ss:$16 sps:$4 sm:$0xff]  }
 0x1e5   :  { %3524 = vmatprep.subr.bf16.mxu0 %v4933_v43  ;;  %3565 = vmatprep.subr.bf16.mxu1 %v4936_v44  ;;  %v4978_v43 = vld [vmem:[#allocation12 + $0x7a4] ss:$16 sps:$4 sm:$0xff]   ;;  %v4973_v44 = vld [vmem:[#allocation12 + $0x5a0] ss:$16 sps:$4 sm:$0xff]  }
 0x1e8   :  { %3525 = vmatpush1.bf16.msra.mxu0 %v4931_v45  ;;  %3566 = vmatpush1.bf16.msra.mxu1 %v4934_v46  ;;  %v4976_v45 = vld [vmem:[#allocation12 + $0x7a0] ss:$16 sps:$4 sm:$0xff]   ;;  %v4981_v46 = vld [vmem:[#allocation12 + $0x584] ss:$16 sps:$4 sm:$0xff]  }
 0x1e9   :  { %3526 = vmatprep.subr.bf16.mxu0 %v4939_v47  ;;  %3567 = vmatprep.subr.bf16.mxu1 %v4942_v0  ;;  %v4984_v47 = vld [vmem:[#allocation12 + $0x784] ss:$16 sps:$4 sm:$0xff]   ;;  %v4979_v0 = vld [vmem:[#allocation12 + $0x580] ss:$16 sps:$4 sm:$0xff]  }
 0x1ec   :  { %3527 = vmatpush1.bf16.msra.mxu0 %v4937_v49  ;;  %3568 = vmatpush1.bf16.msra.mxu1 %v4940_v56  ;;  %v4982_v49 = vld [vmem:[#allocation12 + $0x780] ss:$16 sps:$4 sm:$0xff]   ;;  %v4987_v56 = vld [vmem:[#allocation12 + $0x564] ss:$16 sps:$4 sm:$0xff]  }
 0x1ed   :  { %3528 = vmatprep.subr.bf16.mxu0 %v4945_v57  ;;  %3569 = vmatprep.subr.bf16.mxu1 %v4948_v50  ;;  %v4990_v57 = vld [vmem:[#allocation12 + $0x764] ss:$16 sps:$4 sm:$0xff]   ;;  %v4985_v50 = vld [vmem:[#allocation12 + $0x560] ss:$16 sps:$4 sm:$0xff]  }
 0x1ef   :  { %v1758_v5 = vpop.f32.mrf.mxu0  ;;  %v1799_v8 = vpop.f32.mrf.mxu1 }
 0x1f0   :  { %v1810_v7 = vadd.f32 %v1758_v5, %v5605_v48  ;;  %3529 = vmatpush1.bf16.msra.mxu0 %v4943_v62  ;;  %v1812_v13 = vadd.f32 %v1799_v8, %v5607_v51  ;;  %3570 = vmatpush1.bf16.msra.mxu1 %v4946_v1  ;;  %v4988_v62 = vld [vmem:[#allocation12 + $0x760] ss:$16 sps:$4 sm:$0xff]   ;;  %v4996_v1 = vld [vmem:[#allocation12 + $0x744] ss:$16 sps:$4 sm:$0xff]  }
 0x1f1   :  { %v1760_v14 = vpop.f32.mrf.mxu0  ;;  %3530 = vmatprep.subr.bf16.mxu0 %v4951_v3  ;;  %v1801_v53 = vpop.f32.mrf.mxu1  ;;  %3571 = vmatprep.subr.bf16.mxu1 %v4954_v4  ;;  %v4994_v3 = vld [vmem:[#allocation12 + $0x740] ss:$16 sps:$4 sm:$0xff]   ;;  %v4999_v4 = vld [vmem:[#allocation12 + $0x524] ss:$16 sps:$4 sm:$0xff]  }
 0x1f2   :  { %v5654_v30 = vadd.f32 %v5598_v33, %v1810_v7  ;;  %v1811_v48 = vadd.f32 %v1760_v14, %v1211_v6  ;;  %v5657_v19 = vadd.f32 %v5601_v11, %v1812_v13  ;;  %v1813_v32 = vadd.f32 %v1801_v53, %v1252_v12  ;;  %v4961_v11 = vld [vmem:[#allocation12 + $0x5e0] ss:$16 sps:$4 sm:$0xff]   ;;  %v5002_v5 = vld [vmem:[#allocation12 + $0x724] ss:$16 sps:$4 sm:$0xff]   ;;  %v5011_v14 = vld [vmem:[#allocation12 + $0xec] ss:$16 sps:$4 sm:$0xff]  }
 0x1f3   :  { %v1762_v54 = vpop.f32.mrf.mxu0  ;;  %v1803_v21 = vpop.f32.mrf.mxu1  ;;  %v4997_v6 = vld [vmem:[#allocation12 + $0x520] ss:$16 sps:$4 sm:$0xff]   ;;  %v5005_v8 = vld [vmem:[#allocation12 + $0x504] ss:$16 sps:$4 sm:$0xff]   ;;  %v5012_v53 = vld [vmem:[#allocation12 + $0x2e8] ss:$16 sps:$4 sm:$0xff]  }
 0x1f4   :  { %v1860_v51 = vadd.f32 %v1838_v9, %v1811_v48  ;;  %3531 = vmatpush1.bf16.msra.mxu0 %v4949_v10  ;;  %v1862_v31 = vadd.f32 %v1846_v15, %v1813_v32  ;;  %3572 = vmatpush1.bf16.msra.mxu1 %v4952_v52  ;;  %v5000_v7 = vld [vmem:[#allocation12 + $0x720] ss:$16 sps:$4 sm:$0xff]   ;;  %v5008_v9 = vld [vmem:[#allocation12 + $0x704] ss:$16 sps:$4 sm:$0xff]   ;;  %v1867_v12 = vmax.f32 %v5654_v30, 0.0  ;;  %v1869_v15 = vmax.f32 %v5657_v19, 0.0 }
 0x1f5   :  { %3532 = vmatprep.subr.bf16.mxu0 %v4957_v16  ;;  %v1763_v33 = vpop.f32.mrf.mxu0  ;;  %3573 = vmatprep.subr.bf16.mxu1 %v4960_v17  ;;  %v1804_v28 = vpop.f32.mrf.mxu1  ;;  %v5003_v10 = vld [vmem:[#allocation12 + $0x500] ss:$16 sps:$4 sm:$0xff]   ;;  %v5014_v52 = vld [vmem:[#allocation12 + $0x2ec] ss:$16 sps:$4 sm:$0xff]   ;;  %v5009_v16 = vld [vmem:[#allocation12 + $0xe8] ss:$16 sps:$4 sm:$0xff]  }
 0x1f6   :  { %v1868_v55 = vmax.f32 %v1860_v51, 0.0  ;;  %v1870_v34 = vmax.f32 %v1862_v31, 0.0  ;;  %v5006_v13 = vld [vmem:[#allocation12 + $0x700] ss:$16 sps:$4 sm:$0xff]   ;;  %v5667_v48 = vpack.c.bf16 %v1867_v12, %v1867_v12  ;;  %v5669_v17 = vpack.c.bf16 %v1869_v15, %v1869_v15  ;;  %v5017_v32 = vld [vmem:[#allocation12 + $0xcc] ss:$16 sps:$4 sm:$0xff]  }
 0x1f7   :  { %v5020_v30 = vld [vmem:[#allocation12 + $0x2cc] ss:$16 sps:$4 sm:$0xff]   ;;  %v5015_v19 = vld [vmem:[#allocation12 + $0xc8] ss:$16 sps:$4 sm:$0xff]  }
 0x1f8   :  { %v5659_v35 = vpack.c.bf16 %v1868_v55, %v1868_v55  ;;  %3533 = vmatpush1.bf16.msra.mxu0 %v4955_v20  ;;  %v5661_v37 = vpack.c.bf16 %v1870_v34, %v1870_v34  ;;  %3574 = vmatpush1.bf16.msra.mxu1 %v4958_v22  ;;  %v5018_v54 = vld [vmem:[#allocation12 + $0x2c8] ss:$16 sps:$4 sm:$0xff]   ;;  %v5023_v51 = vld [vmem:[#allocation12 + $0xac] ss:$16 sps:$4 sm:$0xff]  }
 0x1f9   :  { %3534 = vmatprep.subr.bf16.mxu0 %v4963_v24  ;;  %3575 = vmatprep.subr.bf16.mxu1 %v4966_v25  ;;  %v5026_v20 = vld [vmem:[#allocation12 + $0x2ac] ss:$16 sps:$4 sm:$0xff]   ;;  %v5021_v21 = vld [vmem:[#allocation12 + $0xa8] ss:$16 sps:$4 sm:$0xff]  }
 0x1fa   :  { %3550 = vmatprep.mubr.bf16.mxu0 %v5659_v35  ;;  %3591 = vmatprep.mubr.bf16.mxu1 %v5661_v37  ;;  %v5024_v31 = vld [vmem:[#allocation12 + $0x2a8] ss:$16 sps:$4 sm:$0xff]   ;;  %v5029_v22 = vld [vmem:[#allocation12 + $0x8c] ss:$16 sps:$4 sm:$0xff]  }
 0x1fb   :  { %v5032_v24 = vld [vmem:[#allocation12 + $0x28c] ss:$16 sps:$4 sm:$0xff]   ;;  %v5027_v33 = vld [vmem:[#allocation12 + $0x88] ss:$16 sps:$4 sm:$0xff]  }
 0x1fc   :  { %3535 = vmatpush2.bf16.msra.mxu0 %v4961_v11  ;;  %3576 = vmatpush2.bf16.msra.mxu1 %v4964_v18  ;;  %v5035_v55 = vld [vmem:[#allocation12 + $0x6c] ss:$16 sps:$4 sm:$0xff]   ;;  %v5036_v28 = vld [vmem:[#allocation12 + $0x268] ss:$16 sps:$4 sm:$0xff]  }
 0x1fd   :  { %3536 = vmatprep.subr.bf16.mxu0 %v4969_v38  ;;  %3577 = vmatprep.subr.bf16.mxu1 %v4972_v39  ;;  %v5038_v25 = vld [vmem:[#allocation12 + $0x26c] ss:$16 sps:$4 sm:$0xff]   ;;  %v5039_v18 = vld [vmem:[#allocation12 + $0x48] ss:$16 sps:$4 sm:$0xff]  }
 0x1fe   :  { %v5041_v34 = vld [vmem:[#allocation12 + $0x4c] ss:$16 sps:$4 sm:$0xff]   ;;  %v5042_v38 = vld [vmem:[#allocation12 + $0x248] ss:$16 sps:$4 sm:$0xff]  }
 0x1ff   :  { %v5044_v11 = vld [vmem:[#allocation12 + $0x24c] ss:$16 sps:$4 sm:$0xff]   ;;  %v5081_v12 = vld [vmem:[#allocation12 + $0x168] ss:$16 sps:$4 sm:$0xff]  }
 0x200   :  { %3537 = vmatpush2.bf16.msra.mxu0 %v4967_v40  ;;  %3578 = vmatpush2.bf16.msra.mxu1 %v4970_v41  ;;  %v5047_v39 = vld [vmem:[#allocation12 + $0x2c] ss:$16 sps:$4 sm:$0xff]   ;;  %v5045_v41 = vld [vmem:[#allocation12 + $0x28] ss:$16 sps:$4 sm:$0xff]  }
 0x201   :  { %3538 = vmatprep.subr.bf16.mxu0 %v4975_v42  ;;  %3579 = vmatprep.subr.bf16.mxu1 %v4978_v43  ;;  %v5050_v40 = vld [vmem:[#allocation12 + $0x22c] ss:$16 sps:$4 sm:$0xff]   ;;  %v5048_v42 = vld [vmem:[#allocation12 + $0x228] ss:$16 sps:$4 sm:$0xff]  }
 0x202   :  { %v5053_v43 = vld [vmem:[#allocation12 + $0xc] ss:$16 sps:$4 sm:$0xff]  }
 0x203   :  { %v5092_v15 = vld [vmem:[#allocation12 + $0x34c] ss:$16 sps:$4 sm:$0xff]  }
 0x204   :  { %3539 = vmatpush2.bf16.msra.mxu0 %v4973_v44  ;;  %3580 = vmatpush2.bf16.msra.mxu1 %v4976_v45  ;;  %v5056_v44 = vld [vmem:[#allocation12 + $0x20c] ss:$16 sps:$4 sm:$0xff]   ;;  %v5051_v45 = vld [vmem:[#allocation12 + $0x8] ss:$16 sps:$4 sm:$0xff]  }
 0x205   :  { %3540 = vmatprep.subr.bf16.mxu0 %v4981_v46  ;;  %3581 = vmatprep.subr.bf16.mxu1 %v4984_v47  ;;  %v5054_v46 = vld [vmem:[#allocation12 + $0x208] ss:$16 sps:$4 sm:$0xff]   ;;  %v5059_v47 = vld [vmem:[#allocation12 + $0x1ec] ss:$16 sps:$4 sm:$0xff]  }
 0x208   :  { %3541 = vmatpush2.bf16.msra.mxu0 %v4979_v0  ;;  %3582 = vmatpush2.bf16.msra.mxu1 %v4982_v49  ;;  %v5062_v0 = vld [vmem:[#allocation12 + $0x3ec] ss:$16 sps:$4 sm:$0xff]   ;;  %v5057_v49 = vld [vmem:[#allocation12 + $0x1e8] ss:$16 sps:$4 sm:$0xff]  }
 0x209   :  { %3542 = vmatprep.subr.bf16.mxu0 %v4987_v56  ;;  %3583 = vmatprep.subr.bf16.mxu1 %v4990_v57  ;;  %v5060_v56 = vld [vmem:[#allocation12 + $0x3e8] ss:$16 sps:$4 sm:$0xff]   ;;  %v5065_v57 = vld [vmem:[#allocation12 + $0x1cc] ss:$16 sps:$4 sm:$0xff]  }
 0x20c   :  { %3543 = vmatpush2.bf16.msra.mxu0 %v4985_v50  ;;  %3584 = vmatpush2.bf16.msra.mxu1 %v4988_v62  ;;  %v5068_v50 = vld [vmem:[#allocation12 + $0x3cc] ss:$16 sps:$4 sm:$0xff]   ;;  %v5063_v62 = vld [vmem:[#allocation12 + $0x1c8] ss:$16 sps:$4 sm:$0xff]  }
 0x20d   :  { %3544 = vmatprep.subr.bf16.mxu0 %v4993_v63  ;;  %3585 = vmatprep.subr.bf16.mxu1 %v4996_v1  ;;  %v5066_v63 = vld [vmem:[#allocation12 + $0x3c8] ss:$16 sps:$4 sm:$0xff]   ;;  %v5071_v1 = vld [vmem:[#allocation12 + $0x1ac] ss:$16 sps:$4 sm:$0xff]  }
 0x210   :  { %3545 = vmatpush2.bf16.msra.mxu0 %v4991_v2  ;;  %3586 = vmatpush2.bf16.msra.mxu1 %v4994_v3  ;;  %v5074_v2 = vld [vmem:[#allocation12 + $0x3ac] ss:$16 sps:$4 sm:$0xff]   ;;  %v5069_v3 = vld [vmem:[#allocation12 + $0x1a8] ss:$16 sps:$4 sm:$0xff]  }
 0x211   :  { %3546 = vmatprep.subr.bf16.mxu0 %v4999_v4  ;;  %3587 = vmatprep.subr.bf16.mxu1 %v5002_v5  ;;  %v5072_v4 = vld [vmem:[#allocation12 + $0x3a8] ss:$16 sps:$4 sm:$0xff]   ;;  %v5077_v5 = vld [vmem:[#allocation12 + $0x18c] ss:$16 sps:$4 sm:$0xff]  }
 0x214   :  { %3547 = vmatpush2.bf16.msra.mxu0 %v4997_v6  ;;  %3588 = vmatpush2.bf16.msra.mxu1 %v5000_v7  ;;  %v5080_v6 = vld [vmem:[#allocation12 + $0x38c] ss:$16 sps:$4 sm:$0xff]   ;;  %v5075_v7 = vld [vmem:[#allocation12 + $0x188] ss:$16 sps:$4 sm:$0xff]  }
 0x215   :  { %3548 = vmatprep.subr.bf16.mxu0 %v5005_v8  ;;  %3589 = vmatprep.subr.bf16.mxu1 %v5008_v9  ;;  %v5078_v8 = vld [vmem:[#allocation12 + $0x388] ss:$16 sps:$4 sm:$0xff]   ;;  %v5083_v9 = vld [vmem:[#allocation12 + $0x16c] ss:$16 sps:$4 sm:$0xff]  }
 0x218   :  { %3549 = vmatpush2.bf16.msra.mxu0 %v5003_v10  ;;  %3590 = vmatpush2.bf16.msra.mxu1 %v5006_v13  ;;  %v5086_v10 = vld [vmem:[#allocation12 + $0x36c] ss:$16 sps:$4 sm:$0xff]   ;;  %v5084_v13 = vld [vmem:[#allocation12 + $0x368] ss:$16 sps:$4 sm:$0xff]  }
 0x219   :  { %3600 = vmatprep.subr.bf16.mxu0 %v5011_v14  ;;  %3641 = vmatprep.subr.bf16.mxu1 %v5014_v52  ;;  %v5089_v14 = vld [vmem:[#allocation12 + $0x14c] ss:$16 sps:$4 sm:$0xff]   ;;  %v5087_v52 = vld [vmem:[#allocation12 + $0x148] ss:$16 sps:$4 sm:$0xff]  }
 0x21b   :  { %3551 = vmatmul.mubr.bf16.vlgmr.msra.gmra.mxu0 %v5667_v48  ;;  %3592 = vmatmul.mubr.bf16.vlgmr.msra.gmra.mxu1 %v5669_v17 }
 0x21c   :  { %3601 = vmatpush1.bf16.msra.mxu0 %v5009_v16  ;;  %3632 = vmatprep.mubr.bf16.mxu0 %v5631_v27  ;;  %v5030_v27 = vld [vmem:[#allocation12 + $0x288] ss:$16 sps:$4 sm:$0xff]  }
 0x21d   :  { %3642 = vmatpush1.bf16.msra.mxu1 %v5012_v53  ;;  %3673 = vmatprep.mubr.bf16.mxu1 %v5635_v23  ;;  %v5033_v23 = vld [vmem:[#allocation12 + $0x68] ss:$16 sps:$4 sm:$0xff]   ;;  %v5095_v53 = vld [vmem:[#allocation12 + $0x12c] ss:$16 sps:$4 sm:$0xff]  }
 0x21e   :  { %3602 = vmatprep.subr.bf16.mxu0 %v5017_v32  ;;  %3643 = vmatprep.subr.bf16.mxu1 %v5020_v30  ;;  %v5090_v16 = vld [vmem:[#allocation12 + $0x348] ss:$16 sps:$4 sm:$0xff]   ;;  %v5098_v32 = vld [vmem:[#allocation12 + $0x32c] ss:$16 sps:$4 sm:$0xff]  }
 0x21f   :  { %v5093_v30 = vld [vmem:[#allocation12 + $0x128] ss:$16 sps:$4 sm:$0xff]  }
 0x220   :  { %3603 = vmatpush1.bf16.msra.mxu0 %v5015_v19  ;;  %v5096_v19 = vld [vmem:[#allocation12 + $0x328] ss:$16 sps:$4 sm:$0xff]  }
 0x221   :  { %3644 = vmatpush1.bf16.msra.mxu1 %v5018_v54  ;;  %3604 = vmatprep.subr.bf16.mxu0 %v5023_v51  ;;  %v5101_v54 = vld [vmem:[#allocation12 + $0x10c] ss:$16 sps:$4 sm:$0xff]  }
 0x222   :  { %3645 = vmatprep.subr.bf16.mxu1 %v5026_v20  ;;  %v5104_v51 = vld [vmem:[#allocation12 + $0x30c] ss:$16 sps:$4 sm:$0xff]   ;;  %v5099_v20 = vld [vmem:[#allocation12 + $0x108] ss:$16 sps:$4 sm:$0xff]  }
 0x224   :  { %3605 = vmatpush1.bf16.msra.mxu0 %v5021_v21  ;;  %v5102_v21 = vld [vmem:[#allocation12 + $0x308] ss:$16 sps:$4 sm:$0xff]  }
 0x225   :  { %3646 = vmatpush1.bf16.msra.mxu1 %v5024_v31  ;;  %3606 = vmatprep.subr.bf16.mxu0 %v5029_v22  ;;  %v5107_v31 = vld [vmem:[#allocation12 + $0x4ec] ss:$16 sps:$4 sm:$0xff]  }
 0x226   :  { %3647 = vmatprep.subr.bf16.mxu1 %v5032_v24  ;;  %v5110_v22 = vld [vmem:[#allocation12 + $0x6ec] ss:$16 sps:$4 sm:$0xff]   ;;  %v5105_v24 = vld [vmem:[#allocation12 + $0x4e8] ss:$16 sps:$4 sm:$0xff]  }
 0x228   :  { %3607 = vmatpush1.bf16.msra.mxu0 %v5027_v33  ;;  %v5108_v33 = vld [vmem:[#allocation12 + $0x6e8] ss:$16 sps:$4 sm:$0xff]  }
 0x229   :  { %3648 = vmatpush1.bf16.msra.mxu1 %v5030_v27  ;;  %3608 = vmatprep.subr.bf16.mxu0 %v5035_v55  ;;  %v5113_v27 = vld [vmem:[#allocation12 + $0x4cc] ss:$16 sps:$4 sm:$0xff]  }
 0x22a   :  { %3649 = vmatprep.subr.bf16.mxu1 %v5038_v25  ;;  %v5116_v55 = vld [vmem:[#allocation12 + $0x6cc] ss:$16 sps:$4 sm:$0xff]   ;;  %v5111_v25 = vld [vmem:[#allocation12 + $0x4c8] ss:$16 sps:$4 sm:$0xff]  }
 0x22c   :  { %3609 = vmatpush1.bf16.msra.mxu0 %v5033_v23  ;;  %v5114_v23 = vld [vmem:[#allocation12 + $0x6c8] ss:$16 sps:$4 sm:$0xff]  }
 0x22d   :  { %3650 = vmatpush1.bf16.msra.mxu1 %v5036_v28  ;;  %3610 = vmatprep.subr.bf16.mxu0 %v5041_v34  ;;  %v5119_v28 = vld [vmem:[#allocation12 + $0x4ac] ss:$16 sps:$4 sm:$0xff]  }
 0x22e   :  { %3651 = vmatprep.subr.bf16.mxu1 %v5044_v11  ;;  %v5122_v34 = vld [vmem:[#allocation12 + $0x6ac] ss:$16 sps:$4 sm:$0xff]   ;;  %v5117_v11 = vld [vmem:[#allocation12 + $0x4a8] ss:$16 sps:$4 sm:$0xff]  }
 0x230   :  { %3611 = vmatpush1.bf16.msra.mxu0 %v5039_v18  ;;  %v5125_v18 = vld [vmem:[#allocation12 + $0x48c] ss:$16 sps:$4 sm:$0xff]  }
 0x231   :  { %3652 = vmatpush1.bf16.msra.mxu1 %v5042_v38  ;;  %3612 = vmatprep.subr.bf16.mxu0 %v5047_v39  ;;  %v5123_v38 = vld [vmem:[#allocation12 + $0x488] ss:$16 sps:$4 sm:$0xff]   ;;  %v5131_v39 = vld [vmem:[#allocation12 + $0x46c] ss:$16 sps:$4 sm:$0xff]  }
 0x232   :  { %3653 = vmatprep.subr.bf16.mxu1 %v5050_v40  ;;  %v5134_v40 = vld [vmem:[#allocation12 + $0x66c] ss:$16 sps:$4 sm:$0xff]  }
 0x234   :  { %3613 = vmatpush1.bf16.msra.mxu0 %v5045_v41  ;;  %v5132_v41 = vld [vmem:[#allocation12 + $0x668] ss:$16 sps:$4 sm:$0xff]  }
 0x235   :  { %3654 = vmatpush1.bf16.msra.mxu1 %v5048_v42  ;;  %3614 = vmatprep.subr.bf16.mxu0 %v5053_v43  ;;  %v5137_v42 = vld [vmem:[#allocation12 + $0x44c] ss:$16 sps:$4 sm:$0xff]  }
 0x236   :  { %3655 = vmatprep.subr.bf16.mxu1 %v5056_v44  ;;  %v5140_v43 = vld [vmem:[#allocation12 + $0x64c] ss:$16 sps:$4 sm:$0xff]   ;;  %v5135_v44 = vld [vmem:[#allocation12 + $0x448] ss:$16 sps:$4 sm:$0xff]  }
 0x238   :  { %3615 = vmatpush1.bf16.msra.mxu0 %v5051_v45  ;;  %v5138_v45 = vld [vmem:[#allocation12 + $0x648] ss:$16 sps:$4 sm:$0xff]  }
 0x239   :  { %3656 = vmatpush1.bf16.msra.mxu1 %v5054_v46  ;;  %3616 = vmatprep.subr.bf16.mxu0 %v5059_v47  ;;  %v5143_v46 = vld [vmem:[#allocation12 + $0x42c] ss:$16 sps:$4 sm:$0xff]  }
 0x23a   :  { %3657 = vmatprep.subr.bf16.mxu1 %v5062_v0  ;;  %v5146_v47 = vld [vmem:[#allocation12 + $0x62c] ss:$16 sps:$4 sm:$0xff]   ;;  %v5141_v0 = vld [vmem:[#allocation12 + $0x428] ss:$16 sps:$4 sm:$0xff]  }
 0x23c   :  { %3617 = vmatpush2.bf16.msra.mxu0 %v5057_v49  ;;  %v5144_v49 = vld [vmem:[#allocation12 + $0x628] ss:$16 sps:$4 sm:$0xff]  }
 0x23d   :  { %3658 = vmatpush2.bf16.msra.mxu1 %v5060_v56  ;;  %3618 = vmatprep.subr.bf16.mxu0 %v5065_v57  ;;  %v5149_v56 = vld [vmem:[#allocation12 + $0x40c] ss:$16 sps:$4 sm:$0xff]  }
 0x23e   :  { %3659 = vmatprep.subr.bf16.mxu1 %v5068_v50  ;;  %v5152_v57 = vld [vmem:[#allocation12 + $0x60c] ss:$16 sps:$4 sm:$0xff]   ;;  %v5147_v50 = vld [vmem:[#allocation12 + $0x408] ss:$16 sps:$4 sm:$0xff]  }
 0x240   :  { %3619 = vmatpush2.bf16.msra.mxu0 %v5063_v62  ;;  %v5150_v62 = vld [vmem:[#allocation12 + $0x608] ss:$16 sps:$4 sm:$0xff]  }
 0x241   :  { %3660 = vmatpush2.bf16.msra.mxu1 %v5066_v63  ;;  %3620 = vmatprep.subr.bf16.mxu0 %v5071_v1  ;;  %v5155_v63 = vld [vmem:[#allocation12 + $0x5ec] ss:$16 sps:$4 sm:$0xff]  }
 0x242   :  { %3661 = vmatprep.subr.bf16.mxu1 %v5074_v2  ;;  %v5158_v1 = vld [vmem:[#allocation12 + $0x7ec] ss:$16 sps:$4 sm:$0xff]   ;;  %v5153_v2 = vld [vmem:[#allocation12 + $0x5e8] ss:$16 sps:$4 sm:$0xff]  }
 0x244   :  { %3621 = vmatpush2.bf16.msra.mxu0 %v5069_v3  ;;  %v5156_v3 = vld [vmem:[#allocation12 + $0x7e8] ss:$16 sps:$4 sm:$0xff]  }
 0x245   :  { %3662 = vmatpush2.bf16.msra.mxu1 %v5072_v4  ;;  %3622 = vmatprep.subr.bf16.mxu0 %v5077_v5  ;;  %v5161_v4 = vld [vmem:[#allocation12 + $0x5cc] ss:$16 sps:$4 sm:$0xff]  }
 0x246   :  { %3663 = vmatprep.subr.bf16.mxu1 %v5080_v6  ;;  %v5164_v5 = vld [vmem:[#allocation12 + $0x7cc] ss:$16 sps:$4 sm:$0xff]   ;;  %v5159_v6 = vld [vmem:[#allocation12 + $0x5c8] ss:$16 sps:$4 sm:$0xff]  }
 0x248   :  { %3623 = vmatpush2.bf16.msra.mxu0 %v5075_v7  ;;  %v5162_v7 = vld [vmem:[#allocation12 + $0x7c8] ss:$16 sps:$4 sm:$0xff]  }
 0x249   :  { %3664 = vmatpush2.bf16.msra.mxu1 %v5078_v8  ;;  %3624 = vmatprep.subr.bf16.mxu0 %v5083_v9  ;;  %v5167_v8 = vld [vmem:[#allocation12 + $0x5ac] ss:$16 sps:$4 sm:$0xff]  }
 0x24a   :  { %3665 = vmatprep.subr.bf16.mxu1 %v5086_v10  ;;  %v5170_v9 = vld [vmem:[#allocation12 + $0x7ac] ss:$16 sps:$4 sm:$0xff]   ;;  %v5165_v10 = vld [vmem:[#allocation12 + $0x5a8] ss:$16 sps:$4 sm:$0xff]  }
 0x24c   :  { %3625 = vmatpush2.bf16.msra.mxu0 %v5081_v12  ;;  %v5168_v12 = vld [vmem:[#allocation12 + $0x7a8] ss:$16 sps:$4 sm:$0xff]  }
 0x24d   :  { %3666 = vmatpush2.bf16.msra.mxu1 %v5084_v13  ;;  %3626 = vmatprep.subr.bf16.mxu0 %v5089_v14  ;;  %v5173_v13 = vld [vmem:[#allocation12 + $0x58c] ss:$16 sps:$4 sm:$0xff]  }
 0x24e   :  { %3667 = vmatprep.subr.bf16.mxu1 %v5092_v15  ;;  %v5176_v14 = vld [vmem:[#allocation12 + $0x78c] ss:$16 sps:$4 sm:$0xff]   ;;  %v5171_v15 = vld [vmem:[#allocation12 + $0x588] ss:$16 sps:$4 sm:$0xff]  }
 0x250   :  { %3627 = vmatpush2.bf16.msra.mxu0 %v5087_v52  ;;  %v5174_v52 = vld [vmem:[#allocation12 + $0x788] ss:$16 sps:$4 sm:$0xff]  }
 0x251   :  { %3668 = vmatpush2.bf16.msra.mxu1 %v5090_v16  ;;  %3628 = vmatprep.subr.bf16.mxu0 %v5095_v53  ;;  %v5179_v16 = vld [vmem:[#allocation12 + $0x56c] ss:$16 sps:$4 sm:$0xff]  }
 0x252   :  { %3669 = vmatprep.subr.bf16.mxu1 %v5098_v32  ;;  %v5182_v53 = vld [vmem:[#allocation12 + $0x76c] ss:$16 sps:$4 sm:$0xff]   ;;  %v5177_v32 = vld [vmem:[#allocation12 + $0x568] ss:$16 sps:$4 sm:$0xff]  }
 0x254   :  { %3629 = vmatpush2.bf16.msra.mxu0 %v5093_v30  ;;  %v5180_v30 = vld [vmem:[#allocation12 + $0x768] ss:$16 sps:$4 sm:$0xff]  }
 0x255   :  { %3670 = vmatpush2.bf16.msra.mxu1 %v5096_v19  ;;  %3630 = vmatprep.subr.bf16.mxu0 %v5101_v54  ;;  %v5185_v19 = vld [vmem:[#allocation12 + $0x54c] ss:$16 sps:$4 sm:$0xff]  }
 0x256   :  { %3671 = vmatprep.subr.bf16.mxu1 %v5104_v51  ;;  %v5188_v54 = vld [vmem:[#allocation12 + $0x74c] ss:$16 sps:$4 sm:$0xff]   ;;  %v5183_v51 = vld [vmem:[#allocation12 + $0x548] ss:$16 sps:$4 sm:$0xff]  }
 0x258   :  { %3631 = vmatpush2.bf16.msra.mxu0 %v5099_v20  ;;  %v5186_v20 = vld [vmem:[#allocation12 + $0x748] ss:$16 sps:$4 sm:$0xff]  }
 0x259   :  { %3672 = vmatpush2.bf16.msra.mxu1 %v5102_v21  ;;  %3682 = vmatprep.subr.bf16.mxu0 %v5107_v31  ;;  %v5191_v21 = vld [vmem:[#allocation12 + $0x52c] ss:$16 sps:$4 sm:$0xff]  }
 0x25a   :  { %3723 = vmatprep.subr.bf16.mxu1 %v5110_v22  ;;  %v5194_v31 = vld [vmem:[#allocation12 + $0x72c] ss:$16 sps:$4 sm:$0xff]   ;;  %v5189_v22 = vld [vmem:[#allocation12 + $0x528] ss:$16 sps:$4 sm:$0xff]  }
 0x25b   :  { %3633 = vmatmul.mubr.bf16.vlgmr.msra.gmra.mxu0 %v5633_v29  ;;  %v5120_v29 = vld [vmem:[#allocation12 + $0x6a8] ss:$16 sps:$4 sm:$0xff]  }
 0x25c   :  { %3674 = vmatmul.mubr.bf16.vlgmr.msra.gmra.mxu1 %v5637_v36  ;;  %3683 = vmatpush1.bf16.msra.mxu0 %v5105_v24  ;;  %v5128_v36 = vld [vmem:[#allocation12 + $0x68c] ss:$16 sps:$4 sm:$0xff]   ;;  %v5192_v24 = vld [vmem:[#allocation12 + $0x728] ss:$16 sps:$4 sm:$0xff]  }
 0x25d   :  { %3714 = vmatprep.mubr.bf16.mxu0 %v5659_v35  ;;  %3724 = vmatpush1.bf16.msra.mxu1 %v5108_v33  ;;  %v5126_v35 = vld [vmem:[#allocation12 + $0x688] ss:$16 sps:$4 sm:$0xff]   ;;  %v5197_v33 = vld [vmem:[#allocation12 + $0x50c] ss:$16 sps:$4 sm:$0xff]  }
 0x25e   :  { %3755 = vmatprep.mubr.bf16.mxu1 %v5661_v37  ;;  %3684 = vmatprep.subr.bf16.mxu0 %v5113_v27  ;;  %v5129_v37 = vld [vmem:[#allocation12 + $0x468] ss:$16 sps:$4 sm:$0xff]   ;;  %v5200_v27 = vld [vmem:[#allocation12 + $0x70c] ss:$16 sps:$4 sm:$0xff]  }
 0x25f   :  { %3725 = vmatprep.subr.bf16.mxu1 %v5116_v55  ;;  %v5195_v55 = vld [vmem:[#allocation12 + $0x508] ss:$16 sps:$4 sm:$0xff]  }
 0x260   :  { %3685 = vmatpush1.bf16.msra.mxu0 %v5111_v25  ;;  %v5198_v25 = vld [vmem:[#allocation12 + $0x708] ss:$16 sps:$4 sm:$0xff]  }
 0x261   :  { %3726 = vmatpush1.bf16.msra.mxu1 %v5114_v23  ;;  %3686 = vmatprep.subr.bf16.mxu0 %v5119_v28  ;;  %v5201_v23 = vld [vmem:[#allocation13 + $0x78] sm:$0xff]  }
 0x262   :  { %3727 = vmatprep.subr.bf16.mxu1 %v5122_v34  ;;  %v5202_v28 = vld [vmem:[#allocation13 + $0x38] sm:$0xff]   ;;  %v5203_v34 = vld [vmem:[#allocation13 + $0x70] sm:$0xff]  }
 0x264   :  { %3687 = vmatpush1.bf16.msra.mxu0 %v5117_v11 }
 0x265   :  { %3728 = vmatpush1.bf16.msra.mxu1 %v5120_v29  ;;  %3688 = vmatprep.subr.bf16.mxu0 %v5125_v18  ;;  %v5204_v18 = vld [vmem:[#allocation13 + $0x30] sm:$0xff]  }
 0x266   :  { %3729 = vmatprep.subr.bf16.mxu1 %v5128_v36 }
 0x268   :  { %3689 = vmatpush1.bf16.msra.mxu0 %v5123_v38  ;;  %v5205_v38 = vld [vmem:[#allocation13 + $0x68] sm:$0xff]  }
 0x269   :  { %3730 = vmatpush1.bf16.msra.mxu1 %v5126_v35  ;;  %3690 = vmatprep.subr.bf16.mxu0 %v5131_v39 }
 0x26a   :  { %3731 = vmatprep.subr.bf16.mxu1 %v5134_v40 }
 0x26c   :  { %3691 = vmatpush1.bf16.msra.mxu0 %v5129_v37  ;;  %v5206_v37 = vld [vmem:[#allocation13 + $0x28] sm:$0xff]  }
 0x26d   :  { %3732 = vmatpush1.bf16.msra.mxu1 %v5132_v41  ;;  %3692 = vmatprep.subr.bf16.mxu0 %v5137_v42  ;;  %v5207_v42 = vld [vmem:[#allocation13 + $0x60] sm:$0xff]  }
 0x26e   :  { %3733 = vmatprep.subr.bf16.mxu1 %v5140_v43 }
 0x270   :  { %3693 = vmatpush1.bf16.msra.mxu0 %v5135_v44  ;;  %v5217_v44 = vld [vmem:[#allocation13 + $0xf8] sm:$0xff]  }
 0x271   :  { %3734 = vmatpush1.bf16.msra.mxu1 %v5138_v45  ;;  %3694 = vmatprep.subr.bf16.mxu0 %v5143_v46  ;;  %v5219_v45 = vld [vmem:[#allocation13 + $0xf0] sm:$0xff]   ;;  %v5209_v46 = vld [vmem:[#allocation13 + $0x58] sm:$0xff]  }
 0x272   :  { %3735 = vmatprep.subr.bf16.mxu1 %v5146_v47  ;;  %v5220_v47 = vld [vmem:[#allocation13 + $0xb0] sm:$0xff]  }
 0x274   :  { %3695 = vmatpush1.bf16.msra.mxu0 %v5141_v0  ;;  %v5221_v0 = vld [vmem:[#allocation13 + $0xe8] sm:$0xff]  }
 0x275   :  { %3736 = vmatpush1.bf16.msra.mxu1 %v5144_v49  ;;  %3696 = vmatprep.subr.bf16.mxu0 %v5149_v56  ;;  %v5210_v49 = vld [vmem:[#allocation13 + $0x18] sm:$0xff]   ;;  %v5211_v56 = vld [vmem:[#allocation13 + $0x50] sm:$0xff]  }
 0x276   :  { %3737 = vmatprep.subr.bf16.mxu1 %v5152_v57  ;;  %v5222_v57 = vld [vmem:[#allocation13 + $0xa8] sm:$0xff]  }
 0x278   :  { %3697 = vmatpush1.bf16.msra.mxu0 %v5147_v50  ;;  %v5223_v50 = vld [vmem:[#allocation13 + $0xe0] sm:$0xff]  }
 0x279   :  { %3738 = vmatpush1.bf16.msra.mxu1 %v5150_v62  ;;  %3698 = vmatprep.subr.bf16.mxu0 %v5155_v63  ;;  %v5212_v62 = vld [vmem:[#allocation13 + $0x10] sm:$0xff]   ;;  %v5213_v63 = vld [vmem:[#allocation13 + $0x48] sm:$0xff]  }
 0x27a   :  { %3739 = vmatprep.subr.bf16.mxu1 %v5158_v1  ;;  %v5224_v1 = vld [vmem:[#allocation13 + $0xa0] sm:$0xff]  }
 0x27c   :  { %3699 = vmatpush2.bf16.msra.mxu0 %v5153_v2  ;;  %v5225_v2 = vld [vmem:[#allocation13 + $0xd8] sm:$0xff]  }
 0x27d   :  { %3740 = vmatpush2.bf16.msra.mxu1 %v5156_v3  ;;  %3700 = vmatprep.subr.bf16.mxu0 %v5161_v4  ;;  %v5214_v3 = vld [vmem:[#allocation13 + $0x8] sm:$0xff]   ;;  %v5215_v4 = vld [vmem:[#allocation13 + $0x40] sm:$0xff]  }
 0x27e   :  { %3741 = vmatprep.subr.bf16.mxu1 %v5164_v5  ;;  %v5226_v5 = vld [vmem:[#allocation13 + $0x98] sm:$0xff]  }
 0x280   :  { %3701 = vmatpush2.bf16.msra.mxu0 %v5159_v6  ;;  %v5216_v6 = vld [vmem:[#allocation13] sm:$0xff]  }
 0x281   :  { %3742 = vmatpush2.bf16.msra.mxu1 %v5162_v7  ;;  %3702 = vmatprep.subr.bf16.mxu0 %v5167_v8  ;;  %v5684_v7 = vld [vmem:[%s5716_s9 + $0x8] sm:$0xf] }
 0x282   :  { %3743 = vmatprep.subr.bf16.mxu1 %v5170_v9  ;;  %v2139_v8 = vrot.slane %v5684_v7, %v1817_v58  ;;  %v2143_v9 = vrot.slane %v5684_v7, %v1821_v60  ;;  %v5230_v60 = vld [vmem:[#allocation13 + $0x88] sm:$0xff]  }
 0x284   :  { %3703 = vmatpush2.bf16.msra.mxu0 %v5165_v10 }
 0x285   :  { %3744 = vmatpush2.bf16.msra.mxu1 %v5168_v12  ;;  %3704 = vmatprep.subr.bf16.mxu0 %v5173_v13 }
 0x286   :  { %3745 = vmatprep.subr.bf16.mxu1 %v5176_v14 }
 0x288   :  { %3705 = vmatpush2.bf16.msra.mxu0 %v5171_v15  ;;  %v5227_v15 = vld [vmem:[#allocation13 + $0xd0] sm:$0xff]  }
 0x289   :  { %3746 = vmatpush2.bf16.msra.mxu1 %v5174_v52  ;;  %3706 = vmatprep.subr.bf16.mxu0 %v5179_v16 }
 0x28a   :  { %3747 = vmatprep.subr.bf16.mxu1 %v5182_v53 }
 0x28c   :  { %3707 = vmatpush2.bf16.msra.mxu0 %v5177_v32  ;;  %v5228_v32 = vld [vmem:[#allocation13 + $0x90] sm:$0xff]  }
 0x28d   :  { %3748 = vmatpush2.bf16.msra.mxu1 %v5180_v30  ;;  %3708 = vmatprep.subr.bf16.mxu0 %v5185_v19 }
 0x28e   :  { %3749 = vmatprep.subr.bf16.mxu1 %v5188_v54 }
 0x290   :  { %3709 = vmatpush2.bf16.msra.mxu0 %v5183_v51 }
 0x291   :  { %3750 = vmatpush2.bf16.msra.mxu1 %v5186_v20  ;;  %3710 = vmatprep.subr.bf16.mxu0 %v5191_v21  ;;  %v5229_v20 = vld [vmem:[#allocation13 + $0xc8] sm:$0xff]  }
 0x292   :  { %3751 = vmatprep.subr.bf16.mxu1 %v5194_v31 }
 0x294   :  { %3711 = vmatpush2.bf16.msra.mxu0 %v5189_v22 }
 0x295   :  { %3752 = vmatpush2.bf16.msra.mxu1 %v5192_v24  ;;  %3712 = vmatprep.subr.bf16.mxu0 %v5197_v33 }
 0x296   :  { %3753 = vmatprep.subr.bf16.mxu1 %v5200_v27 }
 0x298   :  { %3713 = vmatpush2.bf16.msra.mxu0 %v5195_v55  ;;  %v5231_v55 = vld [vmem:[#allocation13 + $0xc0] sm:$0xff]  }
 0x299   :  { %3754 = vmatpush2.bf16.msra.mxu1 %v5198_v25  ;;  %4726 = vmatprep.subr.bf16.mxu0 %v5201_v23  ;;  %v5232_v23 = vld [vmem:[#allocation13 + $0x80] sm:$0xff]  }
 0x29a   :  { %4748 = vmatprep.subr.bf16.mxu1 %v5217_v44  ;;  %v5237_v44 = vld [vmem:[#allocation15 + $0x18] sm:$0xff]  }
 0x29b   :  { %3715 = vmatmul.mubr.bf16.vlgmr.msra.gmra.mxu0 %v5667_v48  ;;  %v3470_v11 = vpop.f32.mrf.mxu0  ;;  %v3511_v29 = vpop.f32.mrf.mxu1  ;;  %v5218_v48 = vld [vmem:[#allocation13 + $0xb8] sm:$0xff]  }
 0x29c   :  { %3756 = vmatmul.mubr.bf16.vlgmr.msra.gmra.mxu1 %v5669_v17  ;;  %4727 = vmatpush3.bf16.msra.mxu0 %v5202_v28  ;;  %v5208_v17 = vld [vmem:[#allocation13 + $0x20] sm:$0xff]   ;;  %v3471_v10 = vadd.f32 %v3470_v11, %v2139_v8 }
 0x29d   :  { %v3472_v36 = vpop.f32.mrf.mxu0  ;;  %4728 = vmatprep.subr.bf16.mxu0 %v5203_v34  ;;  %v3513_v35 = vpop.f32.mrf.mxu1  ;;  %4749 = vmatpush3.bf16.msra.mxu1 %v5218_v48  ;;  %v2147_v48 = vrot.slane %v5684_v7, %v1825_v59 }
 0x29e   :  { %4750 = vmatprep.subr.bf16.mxu1 %v5219_v45  ;;  %v3473_v12 = vadd.f32 %v3472_v36, %v2143_v9  ;;  %v3512_v13 = vadd.f32 %v3511_v29, %v3471_v10  ;;  %v2151_v45 = vrot.slane %v5684_v7, %v1829_v61  ;;  %v5238_v9 = vld [vmem:[#allocation15 + $0x10] sm:$0xff]  }
 0x29f   :  { %v3474_v39 = vpop.f32.mrf.mxu0  ;;  %v3515_v40 = vpop.f32.mrf.mxu1 }
 0x2a0   :  { %4729 = vmatpush3.bf16.msra.mxu0 %v5204_v18  ;;  %v3514_v52 = vadd.f32 %v3513_v35, %v3473_v12  ;;  %v5233_v40 = vld [vmem:[#allocation15 + $0x38] sm:$0xff]  }
 0x2a1   :  { %v3475_v41 = vpop.f32.mrf.mxu0  ;;  %4730 = vmatprep.subr.bf16.mxu0 %v5205_v38  ;;  %v3516_v43 = vpop.f32.mrf.mxu1  ;;  %4751 = vmatpush3.bf16.msra.mxu1 %v5220_v47 }
 0x2a2   :  { %4752 = vmatprep.subr.bf16.mxu1 %v5221_v0  ;;  %v5234_v41 = vld [vmem:[#allocation15 + $0x30] sm:$0xff]   ;;  %v5236_v43 = vld [vmem:[#allocation15 + $0x20] sm:$0xff]  }
 0x2a4   :  { %4731 = vmatpush3.bf16.msra.mxu0 %v5206_v37  ;;  %v5447_v37 = vmov 0.0  }
 0x2a5   :  { %4732 = vmatprep.subr.bf16.mxu0 %v5207_v42  ;;  %4753 = vmatpush3.bf16.msra.mxu1 %v5222_v57  ;;  %v5235_v42 = vld [vmem:[#allocation15 + $0x28] sm:$0xff]  }
 0x2a6   :  { %4754 = vmatprep.subr.bf16.mxu1 %v5223_v50 }
 0x2a8   :  { %4733 = vmatpush3.bf16.msra.mxu0 %v5208_v17 }
 0x2a9   :  { %4734 = vmatprep.subr.bf16.mxu0 %v5209_v46  ;;  %4755 = vmatpush3.bf16.msra.mxu1 %v5224_v1 }
 0x2aa   :  { %4756 = vmatprep.subr.bf16.mxu1 %v5225_v2 }
 0x2ac   :  { %4735 = vmatpush3.bf16.msra.mxu0 %v5210_v49 }
 0x2ad   :  { %4736 = vmatprep.subr.bf16.mxu0 %v5211_v56  ;;  %4757 = vmatpush3.bf16.msra.mxu1 %v5226_v5 }
 0x2ae   :  { %4758 = vmatprep.subr.bf16.mxu1 %v5227_v15 }
 0x2b0   :  { %4737 = vmatpush3.bf16.msra.mxu0 %v5212_v62 }
 0x2b1   :  { %4738 = vmatprep.subr.bf16.mxu0 %v5213_v63  ;;  %4759 = vmatpush3.bf16.msra.mxu1 %v5228_v32 }
 0x2b2   :  { %4760 = vmatprep.subr.bf16.mxu1 %v5229_v20 }
 0x2b4   :  { %4739 = vmatpush3.bf16.msra.mxu0 %v5214_v3 }
 0x2b5   :  { %4740 = vmatprep.subr.bf16.mxu0 %v5215_v4  ;;  %4761 = vmatpush3.bf16.msra.mxu1 %v5230_v60 }
 0x2b6   :  { %4762 = vmatprep.subr.bf16.mxu1 %v5231_v55 }
 0x2b8   :  { %4741 = vmatpush3.bf16.msra.mxu0 %v5216_v6 }
 0x2b9   :  { %4763 = vmatpush3.bf16.msra.mxu1 %v5232_v23  ;;  %4779 = vmatprep.subr.bf16.mxu0 %v5447_v37 }
 0x2db   :  { %v3552_v14 = vpop.f32.mrf.mxu0  ;;  %v3593_v53 = vpop.f32.mrf.mxu1 }
 0x2dc   :  { %v3553_v16 = vadd.f32 %v3552_v14, %v3512_v13  ;;  %v5239_v14 = vld [vmem:[#allocation15 + $0x8] sm:$0xff]  }
 0x2dd   :  { %v3554_v30 = vpop.f32.mrf.mxu0  ;;  %v3595_v51 = vpop.f32.mrf.mxu1 }
 0x2de   :  { %v3594_v19 = vadd.f32 %v3593_v53, %v3553_v16  ;;  %v3555_v54 = vadd.f32 %v3554_v30, %v3514_v52  ;;  %v5240_v52 = vld [vmem:[#allocation15] sm:$0xff]   ;;  %v4684_v16 = vld [vmem:[%s5716_s9 + $0xc] ss:$0 sm:$0xff] }
 0x2df   :  { %v3556_v58 = vpop.f32.mrf.mxu0  ;;  %v3597_v31 = vpop.f32.mrf.mxu1 }
 0x2e0   :  { %v3596_v21 = vadd.f32 %v3595_v51, %v3555_v54  ;;  %v3764_v22 = vmax.f32 %v3594_v19, 0.0  ;;  %v4717_v31 = vld [vmem:[%s5716_s9 + $0xd] ss:$0 sm:$0xff] }
 0x2e1   :  { %v3557_v24 = vpop.f32.mrf.mxu0  ;;  %v3598_v27 = vpop.f32.mrf.mxu1 }
 0x2e2   :  { %v3765_v33 = vmax.f32 %v3596_v21, 0.0  ;;  %v3768_v28 = vpack.c.bf16 %v3764_v22, %v3764_v22 }
 0x2e4   :  { %v3769_v25 = vpack.c.bf16 %v3765_v33, %v3765_v33 }
 0x2e6   :  { %4066 = vmatprep.mubr.bf16.mxu0 %v3769_v25 }
 0x2e7   :  { %4067 = vmatmul.mubr.bf16.vlgmr.msra.gmra.mxu0 %v3768_v28 }
 0x2e8   :  { %4780 = vmatpush3.bf16.msra.mxu0 %v5233_v40  ;;  %4795 = vmatprep.mubr.msk.bf16.mxu0 %vm5448_vm0, %v5447_v37 }
 0x2e9   :  { %4781 = vmatprep.subr.bf16.mxu0 %v5447_v37 }
 0x2ec   :  { %4782 = vmatpush3.bf16.msra.mxu0 %v5234_v41 }
 0x2ed   :  { %4783 = vmatprep.subr.bf16.mxu0 %v5447_v37 }
 0x2f0   :  { %4784 = vmatpush3.bf16.msra.mxu0 %v5235_v42 }
 0x2f1   :  { %4785 = vmatprep.subr.bf16.mxu0 %v5447_v37 }
 0x2f4   :  { %4786 = vmatpush3.bf16.msra.mxu0 %v5236_v43 }
 0x2f5   :  { %4787 = vmatprep.subr.bf16.mxu0 %v5447_v37 }
 0x2f8   :  { %4788 = vmatpush3.bf16.msra.mxu0 %v5237_v44 }
 0x2f9   :  { %4789 = vmatprep.subr.bf16.mxu0 %v5447_v37 }
 0x2fc   :  { %4790 = vmatpush3.bf16.msra.mxu0 %v5238_v9 }
 0x2fd   :  { %4791 = vmatprep.subr.bf16.mxu0 %v5447_v37 }
 0x300   :  { %4792 = vmatpush3.bf16.msra.mxu0 %v5239_v14 }
 0x301   :  { %4793 = vmatprep.subr.bf16.mxu0 %v5447_v37 }
 0x304   :  { %4794 = vmatpush3.bf16.msra.mxu0 %v5240_v52 }
 0x31b   :  { %v3634_v34 = vpop.f32.mrf.mxu0 }
 0x31c   :  { %v3675_v11 = vpop.f32.mrf.mxu1  ;;  %v3635_v17 = vadd.f32 %v3634_v34, %v2147_v48 }
 0x31d   :  { %v3636_v29 = vpop.f32.mrf.mxu0 }
 0x31e   :  { %v3677_v18 = vpop.f32.mrf.mxu1  ;;  %v3637_v46 = vadd.f32 %v3636_v29, %v2151_v45  ;;  %v3676_v47 = vadd.f32 %v3675_v11, %v3635_v17 }
 0x31f   :  { %v3638_v36 = vpop.f32.mrf.mxu0 }
 0x320   :  { %v3679_v38 = vpop.f32.mrf.mxu1  ;;  %v3678_v49 = vadd.f32 %v3677_v18, %v3637_v46 }
 0x321   :  { %v3639_v35 = vpop.f32.mrf.mxu0 }
 0x322   :  { %v3680_v39 = vpop.f32.mrf.mxu1 }
 0x35b   :  { %v3716_v0 = vpop.f32.mrf.mxu0 }
 0x35c   :  { %v3717_v56 = vadd.f32 %v3716_v0, %v3676_v47  ;;  %v3757_v57 = vpop.f32.mrf.mxu1 }
 0x35d   :  { %v3718_v50 = vpop.f32.mrf.mxu0 }
 0x35e   :  { %v3758_v62 = vadd.f32 %v3757_v57, %v3717_v56  ;;  %v3719_v63 = vadd.f32 %v3718_v50, %v3678_v49  ;;  %v3759_v1 = vpop.f32.mrf.mxu1 }
 0x35f   :  { %v3720_v2 = vpop.f32.mrf.mxu0 }
 0x360   :  { %v3760_v3 = vadd.f32 %v3759_v1, %v3719_v63  ;;  %v3761_v4 = vpop.f32.mrf.mxu1  ;;  %v3766_v5 = vmax.f32 %v3758_v62, 0.0 }
 0x361   :  { %v3721_v59 = vpop.f32.mrf.mxu0 }
 0x362   :  { %v3767_v6 = vmax.f32 %v3760_v3, 0.0  ;;  %v3762_v26 = vpop.f32.mrf.mxu1  ;;  %v3770_v61 = vpack.c.bf16 %v3766_v5, %v3766_v5 }
 0x364   :  { %v3771_v8 = vpack.c.bf16 %v3767_v6, %v3767_v6 }
 0x366   :  { %4106 = vmatprep.mubr.bf16.mxu1 %v3771_v8 }
 0x367   :  { %4107 = vmatmul.mubr.bf16.vlgmr.msra.gmra.mxu1 %v3770_v61 }
 0x3a7   :  { %v4742_v7 = vpop.f32.mrf.mxu0 }
 0x3a9   :  { %v4743_v10 = vpop.f32.mrf.mxu0 }
 0x3aa   :  { %v4744_v12 = vadd.f32 %v4743_v10, %v4742_v7 }
 0x3ab   :  { %v4745_v13 = vpop.f32.mrf.mxu0 }
 0x3ac   :  { %v4069_v30 = vadd.f32 %v4744_v12, %v4684_v16 }
 0x3ad   :  { %v4746_v15 = vpop.f32.mrf.mxu0 }
 0x427   :  { %v4764_v53 = vpop.f32.mrf.mxu1 }
 0x429   :  { %v4765_v32 = vpop.f32.mrf.mxu1 }
 0x42a   :  { %v4766_v19 = vadd.f32 %v4765_v32, %v4764_v53 }
 0x42b   :  { %v4767_v54 = vpop.f32.mrf.mxu1 }
 0x42c   :  { %v4109_v51 = vadd.f32 %v4766_v19, %v4069_v30 }
 0x42d   :  { %v4768_v58 = vpop.f32.mrf.mxu1 }
 0x42e   :  { %v4114_v20 = vmax.f32 %v4109_v51, 0.0 }
 0x430   :  { %v4115_v21 = vpack.c.bf16 %v4114_v20, %v4114_v20 }
 0x432   :  { %4796 = vmatmul.mubr.bf16.vlgmr.msra.gmra.mxu0 %v4115_v21 }
 0x4f2   :  { %v4220_v60 = vpop.f32.mrf.mxu0 }
 0x4f3   :  { %v4221_v22 = vadd.f32 %v4717_v31, %v4220_v60 }
 0x4f4   :  { %v4797_v24 = vpop.f32.mrf.mxu0 }
 0x4f5   :  { %4226 = vst [vmem:[%s5717_s10] sm:$0xff] %v4221_v22 }
 0x4f6   :  { %v4223_v33 = vpop.f32.mrf.mxu0 }
 0x4f8   :  { %v4798_v27 = vpop.f32.mrf.mxu0 }
 0x4f9   :  { %4231 = vsyncpa [#allocation3], 1 }
 0x4fa   :  { %4232 = vsyncpa [#allocation5], 1 }
 0x4fb   :  { %4233 = vsyncpa [#allocation8], 1 }
 0x4fc   :  { %4234 = vsyncpa [#allocation11], 1 }
 0x4fd   :  { %4235 = vsyncpa [#allocation14], 1 }

</bundles_post_ra>
